<compile_context>
chip_gen: v5e
topology: v5e:2x2
jax: 0.10.0
libtpu: 0.0.40
codegen_flags: <defaults>
</compile_context>

<pallas_src>
import math

import jax
import jax.numpy as jnp
from jax.experimental import pallas as pl
from jax.experimental.pallas import tpu as pltpu

_MIB = 1024 * 1024
_ROW_ALIGN = 32                      # query-tile row alignment (int8/bf16/f32 sublane safe)
_SCORE_BLOCK_BUDGET = 6 * _MIB       # target size of the f32 (Hg, tq, Sk) score block
_RESIDENT_MASK_BUDGET = 4 * _MIB     # shared int8 mask kept whole in VMEM below this


# --------------------------------------------------------------------------- helpers
def _round_up(x, m):
    return ((x + m - 1) // m) * m


def _largest_divisor_leq(n, cap):
    cap = max(1, min(int(cap), n))
    for d in range(cap, 0, -1):
        if n % d == 0:
            return d
    return 1


def _vmem_limit_target():
    """Generation-aware scoped-VMEM target (kept well under physical capacity)."""
    cap = None
    try:
        cap = getattr(pltpu.get_tpu_info(), "vmem_capacity_bytes", None)
    except Exception:
        cap = None
    if cap is None:
        cap = 64 * _MIB                 # conservative (v7x-sized) fallback
    if cap >= 100 * _MIB:               # v5e / v6e: 128 MiB physical VMEM
        return 96 * _MIB
    return 40 * _MIB                    # v7x: 64 MiB physical VMEM


def _pick_query_tile(Sq, Sk, Hg):
    sq_ceil = _round_up(Sq, _ROW_ALIGN)
    rows = _SCORE_BLOCK_BUDGET // max(Hg * Sk * 4, 1)
    rows = max(128, min(int(rows), 1024))                 # keep the MXU M-dimension fed
    rows = max(_ROW_ALIGN, (rows // _ROW_ALIGN) * _ROW_ALIGN)
    return min(rows, sq_ceil)


def _estimate_vmem_bytes(Hg, tq, Sk, D, itm, return_attn, mask_bytes, kv_buffers):
    q_blk = 2 * Hg * tq * D * itm                          # double-buffered Q tile
    kv_blk = 2 * kv_buffers * Hg * Sk * D * itm            # K + V blocks
    out_blk = 2 * Hg * tq * D * itm
    attn_blk = 2 * Hg * tq * Sk * itm if return_attn else 0
    f32_tmp = 3 * Hg * tq * Sk * 4 + Hg * tq * Sk * itm    # scores / exp / p + p_lo
    return q_blk + kv_blk + out_blk + attn_blk + f32_tmp + mask_bytes


# --------------------------------------------------------------------------- kernel
def _attention_body(q_ref, k_ref, v_ref, mask_ref, out_ref, attn_ref, *,
                    mask_is_resident, tq):
    # q_ref: (Hg, tq, D); k_ref / v_ref: (Hg, Sk, D)
    scale = 1.0 / math.sqrt(q_ref.shape[-1])

    # QK^T: contract over D without an explicit K transpose (batched over the head group).
    scores = jnp.einsum("hqd,hkd->hqk", q_ref[...], k_ref[...],
                        preferred_element_type=jnp.float32)
    scores = scores * scale                       # scale the f32 scores (matches torch exactly)

    if mask_ref is not None:
        if mask_is_resident:
            # Whole (Sq_pad, Sk) int8 mask is VMEM-resident; slice this tile's rows.
            row0 = pl.multiple_of(pl.program_id(1) * tq, tq)
            m = mask_ref[pl.ds(row0, tq), :][None]          # (1, tq, Sk): broadcast over heads
        else:
            m = mask_ref[...]                               # (1 | Hg, tq, Sk)
        scores = jnp.where(m != 0, jnp.float32(-1e9), scores)

    # Numerically-stable softmax over the key axis.
    s_max = jnp.max(scores, axis=-1, keepdims=True)
    e = jnp.exp(scores - s_max)
    denom = jnp.sum(e, axis=-1, keepdims=True)
    # EUP approx reciprocal when p is cast down anyway; exact refinement for f32 outputs.
    approx = jnp.dtype(out_ref.dtype) != jnp.float32
    p = e * pl.reciprocal(denom, approx=approx)

    p_lo = p.astype(v_ref.dtype)                            # single down-cast, reused twice
    out = jnp.einsum("hqk,hkd->hqd", p_lo, v_ref[...],
                     preferred_element_type=jnp.float32)
    out_ref[...] = out.astype(out_ref.dtype)

    if attn_ref is not None:
        attn_ref[...] = p_lo if attn_ref.dtype == v_ref.dtype else p.astype(attn_ref.dtype)


def _make_kernel(has_mask, mask_is_resident, return_attn, tq):
    def kernel(*refs):
        n_in = 4 if has_mask else 3
        q_ref, k_ref, v_ref = refs[0], refs[1], refs[2]
        mask_ref = refs[3] if has_mask else None
        out_ref = refs[n_in]
        attn_ref = refs[n_in + 1] if return_attn else None
        _attention_body(q_ref, k_ref, v_ref, mask_ref, out_ref, attn_ref,
                        mask_is_resident=mask_is_resident, tq=tq)
    return kernel


# --------------------------------------------------------------------------- wrapper
def scaled_dot_product_attention(query, key, value, mask=None, *, return_attn=True):
    """query: [B, H, Sq, D]; key/value: [B, H, Sk, D]; mask broadcastable to
    [B, H, Sq, Sk] (nonzero = keep, 0 = masked, as in torch masked_fill).
    Returns (output, p_attn) like the torch module; p_attn is None when
    return_attn=False (skips the dominant Sq*Sk HBM writeback)."""
    B, H, Sq, D = query.shape
    Sk = key.shape[-2]
    BH = B * H
    dtype = query.dtype
    itm = jnp.dtype(dtype).itemsize

    q = query.reshape(BH, Sq, D)
    k = key.reshape(BH, Sk, D)
    v = value.reshape(BH, Sk, D)

    # Head-group size: aim for Hg * D >= 128 lanes of MXU / store width per step.
    Hg = _largest_divisor_leq(BH, min(8, max(1, 128 // max(D, 1))))

    # ---- mask classification (exact masked_fill(mask == 0, ...) semantics) ----
    has_mask = mask is not None
    mask_shared = False
    is_masked = None
    if has_mask:
        is_masked = (mask == 0)
        while is_masked.ndim < 4:
            is_masked = is_masked[None]
        mask_shared = (is_masked.shape[0] == 1) and (is_masked.shape[1] == 1)

    # ---- tile-size / VMEM policy ----------------------------------------------
    vmem_target = _vmem_limit_target()
    kv_buffers = 1 if hasattr(pl, "Buffered") else 2
    tq = _pick_query_tile(Sq, Sk, Hg)

    def mask_bytes_for(tq_):
        if not has_mask:
            return 0
        if mask_shared:
            return max(2 * _round_up(Sq, _ROW_ALIGN) * Sk, 2 * tq_ * Sk)
        return 2 * Hg * tq_ * Sk

    while (_estimate_vmem_bytes(Hg, tq, Sk, D, itm, return_attn,
                                mask_bytes_for(tq), kv_buffers) > vmem_target
           and tq > 128):
        tq = max(128, ((tq // 2) // _ROW_ALIGN) * _ROW_ALIGN)
    # TODO(synk): if even tq=128 does not fit (extremely long Sk on v7x), a key-axis tiled
    #             two-pass softmax would be needed rather than shrinking tq further.

    Sq_pad = _round_up(Sq, tq)
    grid = (BH // Hg, Sq_pad // tq)
    if Sq_pad != Sq:
        q = jnp.pad(q, ((0, 0), (0, Sq_pad - Sq), (0, 0)))

    est = _estimate_vmem_bytes(Hg, tq, Sk, D, itm, return_attn,
                               mask_bytes_for(tq), kv_buffers)
    vmem_limit = int(min(vmem_target, max(32 * _MIB, 2 * est)))

    # ---- mask preprocessing ----------------------------------------------------
    mask_input = None
    mask_spec = None
    mask_is_resident = False
    if has_mask:
        if mask_shared:
            m2d = jnp.broadcast_to(is_masked, (1, 1, Sq, Sk)).reshape(Sq, Sk)
            if Sq_pad != Sq:
                m2d = jnp.pad(m2d, ((0, Sq_pad - Sq), (0, 0)))   # padded rows = "keep"
            m2d = m2d.astype(jnp.int8)
            if Sq_pad * Sk <= _RESIDENT_MASK_BUDGET:
                # Single VMEM-resident copy for the whole grid (constant index_map).
                mask_is_resident = True
                mask_input = m2d
                mask_spec = pl.BlockSpec((Sq_pad, Sk), lambda b, qi: (0, 0))
            else:
                mask_input = m2d.reshape(1, Sq_pad, Sk)
                mask_spec = pl.BlockSpec((1, tq, Sk), lambda b, qi: (0, qi, 0))
        else:
            m8 = jnp.broadcast_to(is_masked, (B, H, Sq, Sk)).reshape(BH, Sq, Sk)
            if Sq_pad != Sq:
                m8 = jnp.pad(m8, ((0, 0), (0, Sq_pad - Sq), (0, 0)))
            mask_input = m8.astype(jnp.int8)
            mask_spec = pl.BlockSpec((Hg, tq, Sk), lambda b, qi: (b, qi, 0))

    # ---- specs / outputs -------------------------------------------------------
    q_spec = pl.BlockSpec((Hg, tq, D), lambda b, qi: (b, qi, 0))
    out_spec = pl.BlockSpec((Hg, tq, D), lambda b, qi: (b, qi, 0))
    attn_spec = pl.BlockSpec((Hg, tq, Sk), lambda b, qi: (b, qi, 0))

    out_shapes = [jax.ShapeDtypeStruct((BH, Sq_pad, D), dtype)]
    out_specs = [out_spec]
    if return_attn:
        out_shapes.append(jax.ShapeDtypeStruct((BH, Sq_pad, Sk), dtype))
        out_specs.append(attn_spec)

    kernel = _make_kernel(has_mask, mask_is_resident, return_attn, tq)

    bytes_accessed = (q.size + k.size + v.size) * itm + BH * Sq_pad * D * itm
    if return_attn:
        bytes_accessed += BH * Sq_pad * Sk * itm
    if mask_input is not None:
        bytes_accessed += int(mask_input.size)
    cost = pl.CostEstimate(flops=int(4 * BH * Sq_pad * Sk * D),
                           transcendentals=int(BH * Sq_pad * Sk),
                           bytes_accessed=int(bytes_accessed))

    def run(use_single_buffered_kv):
        kv_kwargs = {}
        if use_single_buffered_kv:
            # K/V block index is invariant along qi -> single buffer halves their footprint.
            kv_kwargs["pipeline_mode"] = pl.Buffered(1)
        kv_spec = pl.BlockSpec((Hg, Sk, D), lambda b, qi: (b, 0, 0), **kv_kwargs)
        in_specs = [q_spec, kv_spec, kv_spec]
        inputs = [q, k, v]
        if has_mask:
            in_specs.append(mask_spec)
            inputs.append(mask_input)
        results = pl.pallas_call(
            kernel,
            out_shape=tuple(out_shapes),
            grid_spec=pltpu.PrefetchScalarGridSpec(
                num_scalar_prefetch=0,
                grid=grid,
                in_specs=in_specs,
                out_specs=out_specs,
            ),
            compiler_params=pltpu.CompilerParams(
                dimension_semantics=("parallel", "parallel"),
                vmem_limit_bytes=vmem_limit,
            ),
            cost_estimate=cost,
        )(*inputs)
        return results if isinstance(results, (tuple, list)) else (results,)

    if kv_buffers == 1:
        try:
            results = run(True)
        except Exception:
            results = run(False)   # installed Pallas rejected pipeline_mode on this spec
    else:
        results = run(False)

    out = results[0][:, :Sq, :].reshape(B, H, Sq, D)
    if not return_attn:
        return out, None
    p_attn = results[1][:, :Sq, :].reshape(B, H, Sq, Sk)
    return out, p_attn


# --------------------------------------------------------------------------- reference
def _reference(query, key, value, mask=None):
    d_k = query.shape[-1]
    scores = jnp.einsum("bhqd,bhkd->bhqk", query, key) / math.sqrt(d_k)
    if mask is not None:
        scores = jnp.where(mask == 0, -1e9, scores)
    p = jax.nn.softmax(scores, axis=-1)
    return jnp.einsum("bhqk,bhkd->bhqd", p, value), p


if __name__ == "__main__":
    # ---- case 1: B=2, H=2, S=8, D=32 with a batch/head-shared causal mask ------
    B, H, S, D = 2, 2, 8, 32
    kq, kk, kv = jax.random.split(jax.random.PRNGKey(0), 3)
    query = jax.random.normal(kq, (B, H, S, D), dtype=jnp.float32)
    key_t = jax.random.normal(kk, (B, H, S, D), dtype=jnp.float32)
    value = jax.random.normal(kv, (B, H, S, D), dtype=jnp.float32)
    causal = jnp.tril(jnp.ones((S, S), dtype=jnp.float32))[None, None, :, :]

    out_m, attn_m = scaled_dot_product_attention(query, key_t, value, mask=causal)
    out_u, attn_u = scaled_dot_product_attention(query, key_t, value, mask=None)
    out_n, attn_n = scaled_dot_product_attention(query, key_t, value, mask=causal,
                                                 return_attn=False)
    jax.block_until_ready((out_m, attn_m, out_u, attn_u, out_n))

    ref_out_m, ref_attn_m = _reference(query, key_t, value, mask=causal)
    ref_out_u, ref_attn_u = _reference(query, key_t, value, mask=None)
    assert jnp.allclose(out_m, ref_out_m, atol=2e-5, rtol=2e-5)
    assert jnp.allclose(attn_m, ref_attn_m, atol=2e-5, rtol=2e-5)
    assert jnp.allclose(out_u, ref_out_u, atol=2e-5, rtol=2e-5)
    assert jnp.allclose(attn_u, ref_attn_u, atol=2e-5, rtol=2e-5)
    assert attn_n is None
    assert jnp.allclose(out_n, ref_out_m, atol=2e-5, rtol=2e-5)

    # ---- case 2: padded Sq + per-batch/head boolean mask ------------------------
    B2, H2, Sq2, Sk2, D2 = 1, 2, 40, 24, 32
    k1, k2, k3, k4 = jax.random.split(jax.random.PRNGKey(1), 4)
    q2 = jax.random.normal(k1, (B2, H2, Sq2, D2), dtype=jnp.float32)
    kk2 = jax.random.normal(k2, (B2, H2, Sk2, D2), dtype=jnp.float32)
    vv2 = jax.random.normal(k3, (B2, H2, Sk2, D2), dtype=jnp.float32)
    m2 = jax.random.bernoulli(k4, 0.7, (B2, H2, Sq2, Sk2))

    out2, attn2 = scaled_dot_product_attention(q2, kk2, vv2, mask=m2)
    jax.block_until_ready((out2, attn2))
    ref_out2, ref_attn2 = _reference(q2, kk2, vv2, mask=m2)
    assert jnp.allclose(out2, ref_out2, atol=2e-5, rtol=2e-5)
    assert jnp.allclose(attn2, ref_attn2, atol=2e-5, rtol=2e-5)

    print("KERNEL_OK")
</pallas_src>

<mosaic_0001>
module attributes {stable_mosaic.version = 11 : i64} {
  func.func @kernel(%arg0: i32, %arg1: i32, %arg2: memref<4x32x32xf32, #tpu.memory_space<vmem>>, %arg3: memref<4x8x32xf32, #tpu.memory_space<vmem>>, %arg4: memref<4x8x32xf32, #tpu.memory_space<vmem>>, %arg5: memref<32x8xi8, #tpu.memory_space<vmem>>, %arg6: memref<4x32x32xf32, #tpu.memory_space<vmem>>, %arg7: memref<4x32x8xf32, #tpu.memory_space<vmem>>) attributes {dimension_semantics = [#tpu.dimension_semantics<parallel>, #tpu.dimension_semantics<parallel>], iteration_bounds = array<i64: 1, 1>, scalar_prefetch = 0 : i64, scratch_operands = 0 : i64, tpu.core_type = #tpu.core_type<tc>, window_params = [{transform_indices = @transform_0, window_bounds = array<i64: 4, 32, 32>}, {pipeline_mode = #tpu.pipeline_mode<synchronous>, transform_indices = @transform_1, window_bounds = array<i64: 4, 8, 32>}, {pipeline_mode = #tpu.pipeline_mode<synchronous>, transform_indices = @transform_2, window_bounds = array<i64: 4, 8, 32>}, {pipeline_mode = #tpu.pipeline_mode<synchronous>, transform_indices = @transform_3, window_bounds = array<i64: 32, 8>}, {transform_indices = @transform_4, window_bounds = array<i64: 4, 32, 32>}, {transform_indices = @transform_5, window_bounds = array<i64: 4, 32, 8>}]} {
    %c0 = arith.constant 0 : index
    %c0_0 = arith.constant 0 : index
    %c0_1 = arith.constant 0 : index
    %0 = vector.load %arg2[%c0, %c0_0, %c0_1] : memref<4x32x32xf32, #tpu.memory_space<vmem>>, vector<4x32x32xf32>
    %c0_2 = arith.constant 0 : index
    %c0_3 = arith.constant 0 : index
    %c0_4 = arith.constant 0 : index
    %1 = vector.load %arg3[%c0_2, %c0_3, %c0_4] : memref<4x8x32xf32, #tpu.memory_space<vmem>>, vector<4x8x32xf32>
    "tpu.trace_start"() <{level = 10 : i32, message = "hqd,hkd->hqk"}> : () -> ()
    %cst = arith.constant dense<0.000000e+00> : vector<4x32x8xf32>
    %2 = tpu.matmul %0, %1, %cst {dimension_numbers = #tpu.dot_dimension_numbers<[2], [2], [1], [1], [0, 0, 0, 1, 1, 1], [0], [0]>} : vector<4x32x32xf32>, vector<4x8x32xf32>, vector<4x32x8xf32> -> vector<4x32x8xf32>
    "tpu.trace_stop"() : () -> ()
    %cst_5 = arith.constant 0.176776692 : f32
    %3 = vector.broadcast %cst_5 : f32 to vector<4x32x8xf32>
    %4 = arith.mulf %2, %3 : vector<4x32x8xf32>
    %c32_i32 = arith.constant 32 : i32
    %5 = arith.muli %arg1, %c32_i32 : i32
    %6 = tpu.assume_multiple %5, 32 : i32
    %7 = arith.index_cast %6 : i32 to index
    %c0_6 = arith.constant 0 : index
    %8 = vector.load %arg5[%7, %c0_6] : memref<32x8xi8, #tpu.memory_space<vmem>>, vector<32x8xi8>
    %9 = vector.shape_cast %8 : vector<32x8xi8> to vector<1x32x8xi8>
    %c0_i8 = arith.constant 0 : i8
    %10 = vector.broadcast %c0_i8 : i8 to vector<1x32x8xi8>
    %11 = arith.cmpi ne, %9, %10 : vector<1x32x8xi8>
    %cst_7 = arith.constant -1.000000e+09 : f32
    %12 = vector.shape_cast %11 : vector<1x32x8xi1> to vector<1x32x8xi1>
    %13 = vector.broadcast %12 : vector<1x32x8xi1> to vector<4x32x8xi1>
    %14 = vector.broadcast %cst_7 : f32 to vector<4x32x8xf32>
    %15 = arith.select %13, %14, %4 : vector<4x32x8xi1>, vector<4x32x8xf32>
    %cst_8 = arith.constant dense<0xFF800000> : vector<4x32xf32>
    %16 = vector.multi_reduction <maximumf>, %15, %cst_8 [2] : vector<4x32x8xf32> to vector<4x32xf32>
    %17 = vector.shape_cast %16 : vector<4x32xf32> to vector<4x32x1xf32>
    %18 = vector.broadcast %17 : vector<4x32x1xf32> to vector<4x32x8xf32>
    %19 = arith.subf %15, %18 : vector<4x32x8xf32>
    %20 = math.exp %19 : vector<4x32x8xf32>
    %cst_9 = arith.constant dense<0.000000e+00> : vector<4x32xf32>
    %21 = vector.multi_reduction <add>, %20, %cst_9 [2] : vector<4x32x8xf32> to vector<4x32xf32>
    %22 = vector.shape_cast %21 : vector<4x32xf32> to vector<4x32x1xf32>
    %23 = tpu.reciprocal %22 : vector<4x32x1xf32> -> vector<4x32x1xf32>
    %24 = vector.broadcast %23 : vector<4x32x1xf32> to vector<4x32x8xf32>
    %25 = arith.mulf %20, %24 : vector<4x32x8xf32>
    %c0_10 = arith.constant 0 : index
    %c0_11 = arith.constant 0 : index
    %c0_12 = arith.constant 0 : index
    %26 = vector.load %arg4[%c0_10, %c0_11, %c0_12] : memref<4x8x32xf32, #tpu.memory_space<vmem>>, vector<4x8x32xf32>
    "tpu.trace_start"() <{level = 10 : i32, message = "hqk,hkd->hqd"}> : () -> ()
    %cst_13 = arith.constant dense<0.000000e+00> : vector<4x32x32xf32>
    %27 = tpu.matmul %25, %26, %cst_13 {dimension_numbers = #tpu.dot_dimension_numbers<[2], [1], [1], [2], [0, 0, 0, 1, 1, 2], [0], [0]>} : vector<4x32x8xf32>, vector<4x8x32xf32>, vector<4x32x32xf32> -> vector<4x32x32xf32>
    "tpu.trace_stop"() : () -> ()
    %c0_14 = arith.constant 0 : index
    %c0_15 = arith.constant 0 : index
    %c0_16 = arith.constant 0 : index
    %28 = vector.load %arg6[%c0_14, %c0_15, %c0_16] : memref<4x32x32xf32, #tpu.memory_space<vmem>>, vector<4x32x32xf32>
    tpu.vector_store %arg6[%c0_14, %c0_15, %c0_16], %27 {strides = array<i32>} : memref<4x32x32xf32, #tpu.memory_space<vmem>>, vector<4x32x32xf32>,
    %c0_17 = arith.constant 0 : index
    %c0_18 = arith.constant 0 : index
    %c0_19 = arith.constant 0 : index
    %29 = vector.load %arg7[%c0_17, %c0_18, %c0_19] : memref<4x32x8xf32, #tpu.memory_space<vmem>>, vector<4x32x8xf32>
    tpu.vector_store %arg7[%c0_17, %c0_18, %c0_19], %25 {strides = array<i32>} : memref<4x32x8xf32, #tpu.memory_space<vmem>>, vector<4x32x8xf32>,
    return
  }
  func.func @transform_0(%arg0: i32, %arg1: i32) -> (i32, i32, i32) {
    %c0_i32 = arith.constant 0 : i32
    %c0_i32_0 = arith.constant 0 : i32
    return %arg0, %arg1, %c0_i32 : i32, i32, i32
  }
  func.func @transform_1(%arg0: i32, %arg1: i32) -> (i32, i32, i32) {
    %c0_i32 = arith.constant 0 : i32
    %c0_i32_0 = arith.constant 0 : i32
    %c0_i32_1 = arith.constant 0 : i32
    return %arg0, %c0_i32, %c0_i32_0 : i32, i32, i32
  }
  func.func @transform_2(%arg0: i32, %arg1: i32) -> (i32, i32, i32) {
    %c0_i32 = arith.constant 0 : i32
    %c0_i32_0 = arith.constant 0 : i32
    %c0_i32_1 = arith.constant 0 : i32
    return %arg0, %c0_i32, %c0_i32_0 : i32, i32, i32
  }
  func.func @transform_3(%arg0: i32, %arg1: i32) -> (i32, i32) {
    %c0_i32 = arith.constant 0 : i32
    %c0_i32_0 = arith.constant 0 : i32
    %c0_i32_1 = arith.constant 0 : i32
    return %c0_i32, %c0_i32_0 : i32, i32
  }
  func.func @transform_4(%arg0: i32, %arg1: i32) -> (i32, i32, i32) {
    %c0_i32 = arith.constant 0 : i32
    %c0_i32_0 = arith.constant 0 : i32
    return %arg0, %arg1, %c0_i32 : i32, i32, i32
  }
  func.func @transform_5(%arg0: i32, %arg1: i32) -> (i32, i32, i32) {
    %c0_i32 = arith.constant 0 : i32
    %c0_i32_0 = arith.constant 0 : i32
    return %arg0, %arg1, %c0_i32 : i32, i32, i32
  }
}

module attributes {stable_mosaic.version = 11 : i64} {
  func.func @kernel(%arg0: i32, %arg1: i32, %arg2: memref<4x32x32xf32, #tpu.memory_space<vmem>>, %arg3: memref<4x8x32xf32, #tpu.memory_space<vmem>>, %arg4: memref<4x8x32xf32, #tpu.memory_space<vmem>>, %arg5: memref<32x8xi8, #tpu.memory_space<vmem>>, %arg6: memref<4x32x32xf32, #tpu.memory_space<vmem>>, %arg7: memref<4x32x8xf32, #tpu.memory_space<vmem>>) attributes {dimension_semantics = [#tpu.dimension_semantics<parallel>, #tpu.dimension_semantics<parallel>], iteration_bounds = array<i64: 1, 1>, scalar_prefetch = 0 : i64, scratch_operands = 0 : i64, tpu.core_type = #tpu.core_type<tc>, window_params = [{transform_indices = @transform_0, window_bounds = array<i64: 4, 32, 32>}, {transform_indices = @transform_1, window_bounds = array<i64: 4, 8, 32>}, {transform_indices = @transform_2, window_bounds = array<i64: 4, 8, 32>}, {pipeline_mode = #tpu.pipeline_mode<synchronous>, transform_indices = @transform_3, window_bounds = array<i64: 32, 8>}, {transform_indices = @transform_4, window_bounds = array<i64: 4, 32, 32>}, {transform_indices = @transform_5, window_bounds = array<i64: 4, 32, 8>}]} {
    %c0 = arith.constant 0 : index
    %c0_0 = arith.constant 0 : index
    %c0_1 = arith.constant 0 : index
    %0 = vector.load %arg2[%c0, %c0_0, %c0_1] : memref<4x32x32xf32, #tpu.memory_space<vmem>>, vector<4x32x32xf32>
    %c0_2 = arith.constant 0 : index
    %c0_3 = arith.constant 0 : index
    %c0_4 = arith.constant 0 : index
    %1 = vector.load %arg3[%c0_2, %c0_3, %c0_4] : memref<4x8x32xf32, #tpu.memory_space<vmem>>, vector<4x8x32xf32>
    "tpu.trace_start"() <{level = 10 : i32, message = "hqd,hkd->hqk"}> : () -> ()
    %cst = arith.constant dense<0.000000e+00> : vector<4x32x8xf32>
    %2 = tpu.matmul %0, %1, %cst {dimension_numbers = #tpu.dot_dimension_numbers<[2], [2], [1], [1], [0, 0, 0, 1, 1, 1], [0], [0]>} : vector<4x32x32xf32>, vector<4x8x32xf32>, vector<4x32x8xf32> -> vector<4x32x8xf32>
    "tpu.trace_stop"() : () -> ()
    %cst_5 = arith.constant 0.176776692 : f32
    %3 = vector.broadcast %cst_5 : f32 to vector<4x32x8xf32>
    %4 = arith.mulf %2, %3 : vector<4x32x8xf32>
    %c32_i32 = arith.constant 32 : i32
    %5 = arith.muli %arg1, %c32_i32 : i32
    %6 = tpu.assume_multiple %5, 32 : i32
    %7 = arith.index_cast %6 : i32 to index
    %c0_6 = arith.constant 0 : index
    %8 = vector.load %arg5[%7, %c0_6] : memref<32x8xi8, #tpu.memory_space<vmem>>, vector<32x8xi8>
    %9 = vector.shape_cast %8 : vector<32x8xi8> to vector<1x32x8xi8>
    %c0_i8 = arith.constant 0 : i8
    %10 = vector.broadcast %c0_i8 : i8 to vector<1x32x8xi8>
    %11 = arith.cmpi ne, %9, %10 : vector<1x32x8xi8>
    %cst_7 = arith.constant -1.000000e+09 : f32
    %12 = vector.shape_cast %11 : vector<1x32x8xi1> to vector<1x32x8xi1>
    %13 = vector.broadcast %12 : vector<1x32x8xi1> to vector<4x32x8xi1>
    %14 = vector.broadcast %cst_7 : f32 to vector<4x32x8xf32>
    %15 = arith.select %13, %14, %4 : vector<4x32x8xi1>, vector<4x32x8xf32>
    %cst_8 = arith.constant dense<0xFF800000> : vector<4x32xf32>
    %16 = vector.multi_reduction <maximumf>, %15, %cst_8 [2] : vector<4x32x8xf32> to vector<4x32xf32>
    %17 = vector.shape_cast %16 : vector<4x32xf32> to vector<4x32x1xf32>
    %18 = vector.broadcast %17 : vector<4x32x1xf32> to vector<4x32x8xf32>
    %19 = arith.subf %15, %18 : vector<4x32x8xf32>
    %20 = math.exp %19 : vector<4x32x8xf32>
    %cst_9 = arith.constant dense<0.000000e+00> : vector<4x32xf32>
    %21 = vector.multi_reduction <add>, %20, %cst_9 [2] : vector<4x32x8xf32> to vector<4x32xf32>
    %22 = vector.shape_cast %21 : vector<4x32xf32> to vector<4x32x1xf32>
    %23 = tpu.reciprocal %22 : vector<4x32x1xf32> -> vector<4x32x1xf32>
    %24 = vector.broadcast %23 : vector<4x32x1xf32> to vector<4x32x8xf32>
    %25 = arith.mulf %20, %24 : vector<4x32x8xf32>
    %c0_10 = arith.constant 0 : index
    %c0_11 = arith.constant 0 : index
    %c0_12 = arith.constant 0 : index
    %26 = vector.load %arg4[%c0_10, %c0_11, %c0_12] : memref<4x8x32xf32, #tpu.memory_space<vmem>>, vector<4x8x32xf32>
    "tpu.trace_start"() <{level = 10 : i32, message = "hqk,hkd->hqd"}> : () -> ()
    %cst_13 = arith.constant dense<0.000000e+00> : vector<4x32x32xf32>
    %27 = tpu.matmul %25, %26, %cst_13 {dimension_numbers = #tpu.dot_dimension_numbers<[2], [1], [1], [2], [0, 0, 0, 1, 1, 2], [0], [0]>} : vector<4x32x8xf32>, vector<4x8x32xf32>, vector<4x32x32xf32> -> vector<4x32x32xf32>
    "tpu.trace_stop"() : () -> ()
    %c0_14 = arith.constant 0 : index
    %c0_15 = arith.constant 0 : index
    %c0_16 = arith.constant 0 : index
    %28 = vector.load %arg6[%c0_14, %c0_15, %c0_16] : memref<4x32x32xf32, #tpu.memory_space<vmem>>, vector<4x32x32xf32>
    tpu.vector_store %arg6[%c0_14, %c0_15, %c0_16], %27 {strides = array<i32>} : memref<4x32x32xf32, #tpu.memory_space<vmem>>, vector<4x32x32xf32>,
    %c0_17 = arith.constant 0 : index
    %c0_18 = arith.constant 0 : index
    %c0_19 = arith.constant 0 : index
    %29 = vector.load %arg7[%c0_17, %c0_18, %c0_19] : memref<4x32x8xf32, #tpu.memory_space<vmem>>, vector<4x32x8xf32>
    tpu.vector_store %arg7[%c0_17, %c0_18, %c0_19], %25 {strides = array<i32>} : memref<4x32x8xf32, #tpu.memory_space<vmem>>, vector<4x32x8xf32>,
    return
  }
  func.func @transform_0(%arg0: i32, %arg1: i32) -> (i32, i32, i32) {
    %c0_i32 = arith.constant 0 : i32
    %c0_i32_0 = arith.constant 0 : i32
    return %arg0, %arg1, %c0_i32 : i32, i32, i32
  }
  func.func @transform_1(%arg0: i32, %arg1: i32) -> (i32, i32, i32) {
    %c0_i32 = arith.constant 0 : i32
    %c0_i32_0 = arith.constant 0 : i32
    %c0_i32_1 = arith.constant 0 : i32
    return %arg0, %c0_i32, %c0_i32_0 : i32, i32, i32
  }
  func.func @transform_2(%arg0: i32, %arg1: i32) -> (i32, i32, i32) {
    %c0_i32 = arith.constant 0 : i32
    %c0_i32_0 = arith.constant 0 : i32
    %c0_i32_1 = arith.constant 0 : i32
    return %arg0, %c0_i32, %c0_i32_0 : i32, i32, i32
  }
  func.func @transform_3(%arg0: i32, %arg1: i32) -> (i32, i32) {
    %c0_i32 = arith.constant 0 : i32
    %c0_i32_0 = arith.constant 0 : i32
    %c0_i32_1 = arith.constant 0 : i32
    return %c0_i32, %c0_i32_0 : i32, i32
  }
  func.func @transform_4(%arg0: i32, %arg1: i32) -> (i32, i32, i32) {
    %c0_i32 = arith.constant 0 : i32
    %c0_i32_0 = arith.constant 0 : i32
    return %arg0, %arg1, %c0_i32 : i32, i32, i32
  }
  func.func @transform_5(%arg0: i32, %arg1: i32) -> (i32, i32, i32) {
    %c0_i32 = arith.constant 0 : i32
    %c0_i32_0 = arith.constant 0 : i32
    return %arg0, %arg1, %c0_i32 : i32, i32, i32
  }
}

</mosaic_0001>

<bundles_post_ra>
// kernel: tpu_custom_call.1
= control target key start
LH: loop header
LB: loop body
LE: loop exit
PB: predicated region body
PF: predicated region fallthrough
CT: control target
= control target key end

     0   :  { %11 = vsyncpa [#allocation3], 0  ;;  %s1919_s0 = inlined_call_operand.hbm [shape: f32[4,32,32], index: 0, kind: input, shape index: {}]   ;;  %s1920_s1 = inlined_call_operand.hbm [shape: f32[4,8,32], index: 1, kind: input, shape index: {}]   ;;  %s1921_s2 = inlined_call_operand.hbm [shape: f32[4,8,32], index: 2, kind: input, shape index: {}]   ;;  %s1922_s3 = inlined_call_operand.vmem [shape: s8[32,8], index: 3, kind: input, shape index: {}]   ;;  %s1923_s4 = inlined_call_operand.hbm [shape: f32[4,32,32], index: 4, kind: output, shape index: {0}]   ;;  %s1924_s5 = inlined_call_operand.vmem [shape: f32[4,32,8], index: 5, kind: output, shape index: {1}]  }
   0x1   :  { %12 = vsyncpa [#allocation6], 0 }
   0x2   :  { %13 = vsyncpa [#allocation4], 0  ;;  %s31_s20 = sshll.u32 %s1920_s1, 4  ;;  %s1151_s21 = smov [#allocation5]   ;;  %s32_s20 = int_to_ptr.hbm [resolvable:$true] %s31_s20 }
   0x3   :  { %s33_s22 = sshll.u32 %s1151_s21, 4  ;;  %s18_s25 = sshll.u32 %s1919_s0, 4  ;;  %s34_s22 = int_to_ptr.vmem [resolvable:$true] %s33_s22  ;;  %s19_s25 = int_to_ptr.hbm [resolvable:$true] %s18_s25 }
   0x4   :  { %s1152_s26 = smov 128   ;;  %s1153_s27 = smov 8  }
   0x5   :  { %39 = dma.hbm_to_vmem [thread:$0]  %s32_s20, 512, %s34_s22, [#allocation6], %s1152_s26, %s1152_s26, %s1153_s27  }
   0x6   :  { %s1154_s28 = smov [#allocation2]   ;;  %s44_s1 = sshll.u32 %s1921_s2, 4  ;;  %s45_s1 = int_to_ptr.hbm [resolvable:$true] %s44_s1 }
   0x7   :  { %s20_s29 = sshll.u32 %s1154_s28, 4  ;;  %s1155_s0 = smov [#allocation7]   ;;  %s21_s29 = int_to_ptr.vmem [resolvable:$true] %s20_s29 }
   0x8   :  { %26 = dma.hbm_to_vmem [thread:$0]  %s19_s25, 2048, %s21_s29, [#allocation3], %s1152_s26, %s1152_s26, %s1153_s27  }
   0x9   :  { %s46_s7 = sshll.u32 %s1155_s0, 4  ;;  %s47_s7 = int_to_ptr.vmem [resolvable:$true] %s46_s7 }
   0xa   :  { %52 = dma.hbm_to_vmem [thread:$0]  %s45_s1, 512, %s47_s7, [#allocation6], %s1152_s26, %s1152_s26, %s1153_s27  }
   0xb   :  { %1145 = dma.done.wait [#allocation3], 2048  }
   0xc   :  { %1146 = vsyncadd [#allocation3], 4294965248 }
   0xd   :  { %1147 = dma.done.wait [#allocation6], 1024  }
   0xe   :  { %1148 = vsyncadd [#allocation6], 4294966272  ;;  %vm1925_vm0 = vcmask 261120   ;;  %v85_v0 = vld [vmem:[#allocation5] sm:$0xff]  ;;  %v87_v1 = vld [vmem:[#allocation5 + $0x10] sm:$0xff]  ;;  %v1156_v21 = vmov 0  }
   0xf   :  { %v88_v2 = vld [vmem:[#allocation5 + $0x18] sm:$0xff]  ;;  %942 = vmatpush.xpose.msk.msra.mxu0 %vm1925_vm0, %v85_v0  ;;  %952 = vmatpush.xpose.msk.msra.mxu2 %vm1925_vm0, %v87_v1  ;;  %v69_v3 = vld [vmem:[#allocation2] sm:$0xff]  ;;  %v86_v6 = vld [vmem:[#allocation5 + $0x8] sm:$0xff]  ;;  %vm331_vm3 = vcmask 64512   ;;  %s922_s22 = sshll.u32 %s1923_s4, 4  ;;  %s923_s22 = int_to_ptr.hbm [resolvable:$true] %s922_s22 }
  0x10   :  { %v77_v4 = vld [vmem:[#allocation2 + $0x40] sm:$0xff]  ;;  %957 = vmatpush.xpose.msk.msra.mxu3 %vm1925_vm0, %v88_v2  ;;  %947 = vmatpush.xpose.msk.msra.mxu1 %vm1925_vm0, %v86_v6  ;;  %v78_v8 = vld [vmem:[#allocation2 + $0x48] sm:$0xff]  ;;  %v71_v12 = vld [vmem:[#allocation2 + $0x10] sm:$0xff] }
  0x11   :  { %v81_v5 = vld [vmem:[#allocation2 + $0x60] sm:$0xff]  ;;  %v70_v9 = vld [vmem:[#allocation2 + $0x8] sm:$0xff]  ;;  %v79_v13 = vld [vmem:[#allocation2 + $0x50] sm:$0xff] }
  0x12   :  { %v73_v7 = vld [vmem:[#allocation2 + $0x20] sm:$0xff]  ;;  %943 = vmatmul.msk.f32.vlgmr.msra.gmra.mxu0 %vm1925_vm0, %v69_v3  ;;  %953 = vmatmul.msk.f32.vlgmr.msra.gmra.mxu2 %vm1925_vm0, %v77_v4  ;;  %v82_v10 = vld [vmem:[#allocation2 + $0x68] sm:$0xff]  ;;  %v83_v14 = vld [vmem:[#allocation2 + $0x70] sm:$0xff] }
  0x13   :  { %958 = vmatmul.msk.f32.vlgmr.msra.gmra.mxu3 %vm1925_vm0, %v81_v5  ;;  %948 = vmatmul.msk.f32.vlgmr.msra.gmra.mxu1 %vm1925_vm0, %v73_v7  ;;  %v74_v11 = vld [vmem:[#allocation2 + $0x28] sm:$0xff]  ;;  %v75_v15 = vld [vmem:[#allocation2 + $0x30] sm:$0xff]  ;;  %v80_v16 = vld [vmem:[#allocation2 + $0x58] sm:$0xff] }
  0x14   :  { %v72_v17 = vld [vmem:[#allocation2 + $0x18] sm:$0xff]  ;;  %v287_v20 = vld [vmem:[%s1922_s3] sm:$0x3]  ;;  %v288_v26 = vld [vmem:[%s1922_s3 + $0x2] sm:$0x3] }
  0x15   :  { %v84_v18 = vld [vmem:[#allocation2 + $0x78] sm:$0xff]  ;;  %vm291_vm1 = vnez %v287_v20  ;;  %vm292_vm4 = vnez %v288_v26  ;;  %v289_v37 = vld [vmem:[%s1922_s3 + $0x4] sm:$0x3]  ;;  %v290_v61 = vld [vmem:[%s1922_s3 + $0x6] sm:$0x3] }
  0x16   :  { %v76_v19 = vld [vmem:[#allocation2 + $0x38] sm:$0xff]  ;;  %v295_v22 = vsel %vm291_vm1, 16843009, %v1156_v21  ;;  %v296_v33 = vsel %vm292_vm4, 16843009, %v1156_v21  ;;  %vm293_vm5 = vnez %v289_v37  ;;  %vm294_vm8 = vnez %v290_v61 }
  0x17   :  { %v299_v23 = vunpack.c.0.s8 %v295_v22  ;;  %v300_v44 = vunpack.c.0.s8 %v296_v33  ;;  %v297_v47 = vsel %vm293_vm5, 16843009, %v1156_v21  ;;  %v298_v7 = vsel %vm294_vm8, 16843009, %v1156_v21 }
  0x18   :  { %v301_v55 = vunpack.c.0.s8 %v297_v47 }
  0x19   :  { %vm1229_vm2 = vcmp.ne.s32.totalorder %v299_v23, 0  ;;  %vm1261_vm6 = vcmp.ne.s32.totalorder %v300_v44, 0 }
  0x1a   :  { %954 = vmatmul.msk.f32.gmra.mxu2 %vm1925_vm0, %v78_v8  ;;  %944 = vmatmul.msk.f32.gmra.mxu0 %vm1925_vm0, %v70_v9  ;;  %vm1282_vm7 = vcmp.ne.s32.totalorder %v301_v55, 0 }
  0x1b   :  { %959 = vmatmul.msk.f32.gmra.mxu3 %vm1925_vm0, %v82_v10  ;;  %949 = vmatmul.msk.f32.gmra.mxu1 %vm1925_vm0, %v74_v11  ;;  %v302_v11 = vunpack.c.0.s8 %v298_v7 }
  0x1d   :  { %vm1312_vm9 = vcmp.ne.s32.totalorder %v302_v11, 0 }
  0x22   :  { %945 = vmatmul.msk.f32.gmra.mxu0 %vm1925_vm0, %v71_v12  ;;  %955 = vmatmul.msk.f32.gmra.mxu2 %vm1925_vm0, %v79_v13 }
  0x23   :  { %960 = vmatmul.msk.f32.gmra.mxu3 %vm1925_vm0, %v83_v14  ;;  %950 = vmatmul.msk.f32.gmra.mxu1 %vm1925_vm0, %v75_v15 }
  0x2a   :  { %956 = vmatmul.msk.f32.gmra.mxu2 %vm1925_vm0, %v80_v16  ;;  %946 = vmatmul.msk.f32.gmra.mxu0 %vm1925_vm0, %v72_v17 }
  0x2b   :  { %961 = vmatmul.msk.f32.gmra.mxu3 %vm1925_vm0, %v84_v18  ;;  %951 = vmatmul.msk.f32.gmra.mxu1 %vm1925_vm0, %v76_v19 }
  0x8f   :  { %v122_v24 = vpop.f32.mrf.mxu0 }
  0x90   :  { %v266_v27 = vmul.f32 0.17677669, %v122_v24  ;;  %v166_v28 = vpop.f32.mrf.mxu1 }
  0x91   :  { %v270_v30 = vmul.f32 0.17677669, %v166_v28 }
  0x92   :  { %v1238_v29 = vsel %vm1229_vm2, -1e+09, %v266_v27 }
  0x93   :  { %v332_v31 = vsel %vm331_vm3, %v1238_v29, -inf  ;;  %v1244_v36 = vsel %vm1229_vm2, -1e+09, %v270_v30 }
  0x94   :  { %333 = vmax.xlane.f32.xlu1 %v332_v31  ;;  %v344_v42 = vsel %vm331_vm3, %v1244_v36, -inf }
  0x95   :  { %v210_v32 = vpop.f32.mrf.mxu2 }
  0x96   :  { %v274_v34 = vmul.f32 0.17677669, %v210_v32  ;;  %v254_v35 = vpop.f32.mrf.mxu3 }
  0x97   :  { %v125_v38 = vpop.f32.mrf.mxu0  ;;  %v278_v39 = vmul.f32 0.17677669, %v254_v35 }
  0x98   :  { %v1251_v40 = vsel %vm1229_vm2, -1e+09, %v274_v34  ;;  %v169_v43 = vpop.f32.mrf.mxu1  ;;  %v267_v56 = vmul.f32 0.17677669, %v125_v38 }
  0x99   :  { %v356_v41 = vsel %vm331_vm3, %v1251_v40, -inf  ;;  %v271_v45 = vmul.f32 0.17677669, %v169_v43  ;;  %v1259_v46 = vsel %vm1229_vm2, -1e+09, %v278_v39 }
  0x9a   :  { %357 = vmax.xlane.f32.xlu0 %v356_v41  ;;  %v368_v53 = vsel %vm331_vm3, %v1259_v46, -inf  ;;  %v1292_v1 = vsel %vm1261_vm6, -1e+09, %v267_v56 }
  0x9b   :  { %v1267_v52 = vsel %vm1261_vm6, -1e+09, %v271_v45  ;;  %v335_v6 = vsel %vm331_vm3, %v1292_v1, -inf }
  0x9c   :  { %345 = vmax.xlane.f32.xlu1 %v344_v42  ;;  %v347_v60 = vsel %vm331_vm3, %v1267_v52, -inf }
  0x9d   :  { %v213_v48 = vpop.f32.mrf.mxu2 }
  0x9e   :  { %v275_v50 = vmul.f32 0.17677669, %v213_v48  ;;  %v257_v51 = vpop.f32.mrf.mxu3 }
  0x9f   :  { %v128_v54 = vpop.f32.mrf.mxu0  ;;  %v279_v57 = vmul.f32 0.17677669, %v257_v51 }
  0xa0   :  { %v1273_v58 = vsel %vm1261_vm6, -1e+09, %v275_v50  ;;  %v268_v62 = vmul.f32 0.17677669, %v128_v54  ;;  %v172_v12 = vpop.f32.mrf.mxu1 }
  0xa1   :  { %v359_v59 = vsel %vm331_vm3, %v1273_v58, -inf  ;;  %v1288_v0 = vsel %vm1261_vm6, -1e+09, %v279_v57  ;;  %v272_v21 = vmul.f32 0.17677669, %v172_v12 }
  0xa2   :  { %369 = vmax.xlane.f32.xlu0 %v368_v53  ;;  %360 = vmax.xlane.f32.xlu2 %v359_v59  ;;  %v1296_v4 = vsel %vm1282_vm7, -1e+09, %v268_v62  ;;  %v371_v5 = vsel %vm331_vm3, %v1288_v0, -inf }
  0xa3   :  { %v338_v10 = vsel %vm331_vm3, %v1296_v4, -inf  ;;  %v1328_v25 = vsel %vm1282_vm7, -1e+09, %v272_v21 }
  0xa4   :  { %348 = vmax.xlane.f32.xlu1 %v347_v60  ;;  %v350_v30 = vsel %vm331_vm3, %v1328_v25, -inf }
  0xa5   :  { %v216_v2 = vpop.f32.mrf.mxu2 }
  0xa6   :  { %v260_v3 = vpop.f32.mrf.mxu3  ;;  %v276_v9 = vmul.f32 0.17677669, %v216_v2 }
  0xa7   :  { %v280_v8 = vmul.f32 0.17677669, %v260_v3  ;;  %v131_v27 = vpop.f32.mrf.mxu0 }
  0xa8   :  { %v1306_v13 = vsel %vm1282_vm7, -1e+09, %v276_v9  ;;  %v175_v28 = vpop.f32.mrf.mxu1  ;;  %v269_v32 = vmul.f32 0.17677669, %v131_v27 }
  0xa9   :  { %v1310_v14 = vsel %vm1282_vm7, -1e+09, %v280_v8  ;;  %v362_v19 = vsel %vm331_vm3, %v1306_v13, -inf  ;;  %v273_v33 = vmul.f32 0.17677669, %v175_v28 }
  0xaa   :  { %372 = vmax.xlane.f32.xlu2 %v371_v5  ;;  %336 = vmax.xlane.f32.xlu0 %v335_v6  ;;  %v374_v20 = vsel %vm331_vm3, %v1310_v14, -inf  ;;  %v1344_v35 = vsel %vm1312_vm9, -1e+09, %v269_v32 }
  0xab   :  { %v1340_v34 = vsel %vm1312_vm9, -1e+09, %v273_v33  ;;  %v341_v38 = vsel %vm331_vm3, %v1344_v35, -inf }
  0xac   :  { %339 = vmax.xlane.f32.xlu1 %v338_v10  ;;  %v353_v37 = vsel %vm331_vm3, %v1340_v34, -inf }
  0xad   :  { %v219_v15 = vpop.f32.mrf.mxu2 }
  0xae   :  { %v263_v16 = vpop.f32.mrf.mxu3  ;;  %v277_v22 = vmul.f32 0.17677669, %v219_v15 }
  0xaf   :  { %v281_v18 = vmul.f32 0.17677669, %v263_v16 }
  0xb0   :  { %v1332_v26 = vsel %vm1312_vm9, -1e+09, %v277_v22 }
  0xb1   :  { %v1322_v23 = vsel %vm1312_vm9, -1e+09, %v281_v18  ;;  %v365_v31 = vsel %vm331_vm3, %v1332_v26, -inf }
  0xb2   :  { %363 = vmax.xlane.f32.xlu2 %v362_v19  ;;  %375 = vmax.xlane.f32.xlu0 %v374_v20  ;;  %v377_v24 = vsel %vm331_vm3, %v1322_v23, -inf }
  0xb4   :  { %378 = vmax.xlane.f32.xlu1 %v377_v24 }
  0xba   :  { %351 = vmax.xlane.f32.xlu2 %v350_v30  ;;  %366 = vmax.xlane.f32.xlu0 %v365_v31 }
  0xc2   :  { %354 = vmax.xlane.f32.xlu0 %v353_v37  ;;  %342 = vmax.xlane.f32.xlu2 %v341_v38 }
 0x107   :  { %v334_v39 = vpop.xlane.xlu1 %333 }
 0x108   :  { %v380_v41 = vsub.f32 %v1238_v29, %v334_v39 }
 0x10a   :  { %v396_v42 = vmul.f32 1.442695, %v380_v41 }
 0x10c   :  { %985 = vpow2.f32 %v396_v42 }
 0x10d   :  { %v358_v43 = vpop.xlane.xlu0 %357 }
 0x10e   :  { %v388_v47 = vsub.f32 %v1251_v40, %v358_v43 }
 0x10f   :  { %v346_v44 = vpop.xlane.xlu1 %345 }
 0x110   :  { %v384_v45 = vsub.f32 %v1244_v36, %v346_v44  ;;  %v412_v51 = vmul.f32 1.442695, %v388_v47 }
 0x112   :  { %v1353_v48 = vpop.eup %985  ;;  %v404_v49 = vmul.f32 1.442695, %v384_v45 }
 0x113   :  { %v428_v50 = vsel %vm331_vm3, %v1353_v48, 0.0 }
 0x114   :  { %987 = vpow2.f32 %v404_v49  ;;  %429 = vadd.xlane.f32.xlu0 %v428_v50 }
 0x115   :  { %v370_v53 = vpop.xlane.xlu0 %369  ;;  %v361_v54 = vpop.xlane.xlu2 %360  ;;  %989 = vpow2.f32 %v412_v51 }
 0x116   :  { %v392_v29 = vsub.f32 %v1259_v46, %v370_v53 }
 0x117   :  { %v349_v55 = vpop.xlane.xlu1 %348 }
 0x118   :  { %v420_v56 = vmul.f32 1.442695, %v392_v29  ;;  %v385_v57 = vsub.f32 %v1267_v52, %v349_v55  ;;  %v389_v52 = vsub.f32 %v1273_v58, %v361_v54 }
 0x11a   :  { %v1359_v36 = vpop.eup %987  ;;  %991 = vpow2.f32 %v420_v56  ;;  %v406_v59 = vmul.f32 1.442695, %v385_v57 }
 0x11b   :  { %v440_v40 = vsel %vm331_vm3, %v1359_v36, 0.0  ;;  %v1365_v46 = vpop.eup %989 }
 0x11c   :  { %441 = vadd.xlane.f32.xlu1 %v440_v40  ;;  %993 = vpow2.f32 %v406_v59  ;;  %v716_v40 = vld [vmem:[#allocation7] sm:$0xff]  ;;  %v718_v59 = vld [vmem:[#allocation7 + $0x10] sm:$0xff] }
 0x11d   :  { %v373_v60 = vpop.xlane.xlu2 %372  ;;  %v337_v61 = vpop.xlane.xlu0 %336  ;;  %747 = vmatpush.msrb.mxu0 %v716_v40  ;;  %829 = vmatpush.msrb.mxu2 %v718_v59 }
 0x11e   :  { %v393_v62 = vsub.f32 %v1288_v0, %v373_v60  ;;  %v381_v63 = vsub.f32 %v1292_v1, %v337_v61  ;;  %v452_v0 = vsel %vm331_vm3, %v1365_v46, 0.0  ;;  %v414_v1 = vmul.f32 1.442695, %v389_v52  ;;  %v719_v60 = vld [vmem:[#allocation7 + $0x18] sm:$0xff]  ;;  %v717_v61 = vld [vmem:[#allocation7 + $0x8] sm:$0xff] }
 0x11f   :  { %v340_v7 = vpop.xlane.xlu1 %339  ;;  %870 = vmatpush.msrb.mxu3 %v719_v60  ;;  %788 = vmatpush.msrb.mxu1 %v717_v61 }
 0x120   :  { %v1367_v2 = vpop.eup %991  ;;  %v422_v3 = vmul.f32 1.442695, %v393_v62  ;;  %v398_v5 = vmul.f32 1.442695, %v381_v63  ;;  %v382_v15 = vsub.f32 %v1296_v4, %v340_v7 }
 0x121   :  { %v464_v6 = vsel %vm331_vm3, %v1367_v2, 0.0 }
 0x122   :  { %995 = vpow2.f32 %v422_v3  ;;  %465 = vadd.xlane.f32.xlu2 %v464_v6  ;;  %v1374_v10 = vpop.eup %993 }
 0x123   :  { %997 = vpow2.f32 %v398_v5  ;;  %v443_v20 = vsel %vm331_vm3, %v1374_v10, 0.0 }
 0x124   :  { %453 = vadd.xlane.f32.xlu1 %v452_v0  ;;  %999 = vpow2.f32 %v414_v1 }
 0x125   :  { %v364_v8 = vpop.xlane.xlu2 %363  ;;  %v376_v9 = vpop.xlane.xlu0 %375 }
 0x126   :  { %v390_v58 = vsub.f32 %v1306_v13, %v364_v8  ;;  %v394_v11 = vsub.f32 %v1310_v14, %v376_v9  ;;  %v400_v14 = vmul.f32 1.442695, %v382_v15 }
 0x127   :  { %v379_v21 = vpop.xlane.xlu1 %378 }
 0x128   :  { %v1378_v12 = vpop.eup %995  ;;  %v416_v16 = vmul.f32 1.442695, %v390_v58  ;;  %v424_v17 = vmul.f32 1.442695, %v394_v11  ;;  %v395_v31 = vsub.f32 %v1322_v23, %v379_v21 }
 0x129   :  { %v1381_v18 = vpop.eup %997  ;;  %v467_v19 = vsel %vm331_vm3, %v1378_v12, 0.0 }
 0x12a   :  { %1001 = vpow2.f32 %v416_v16  ;;  %468 = vadd.xlane.f32.xlu0 %v467_v19  ;;  %444 = vadd.xlane.f32.xlu2 %v443_v20  ;;  %v431_v13 = vsel %vm331_vm3, %v1381_v18, 0.0  ;;  %v1389_v24 = vpop.eup %999 }
 0x12b   :  { %1003 = vpow2.f32 %v424_v17  ;;  %v455_v39 = vsel %vm331_vm3, %v1389_v24, 0.0 }
 0x12c   :  { %432 = vadd.xlane.f32.xlu1 %v431_v13  ;;  %1005 = vpow2.f32 %v400_v14 }
 0x12d   :  { %v352_v4 = vpop.xlane.xlu2 %351  ;;  %v367_v22 = vpop.xlane.xlu0 %366 }
 0x12e   :  { %v386_v27 = vsub.f32 %v1328_v25, %v352_v4  ;;  %v391_v28 = vsub.f32 %v1332_v26, %v367_v22  ;;  %v426_v26 = vmul.f32 1.442695, %v395_v31 }
 0x130   :  { %v1393_v30 = vpop.eup %1001  ;;  %v408_v32 = vmul.f32 1.442695, %v386_v27  ;;  %v418_v33 = vmul.f32 1.442695, %v391_v28 }
 0x131   :  { %v1396_v37 = vpop.eup %1003  ;;  %v458_v38 = vsel %vm331_vm3, %v1393_v30, 0.0 }
 0x132   :  { %1007 = vpow2.f32 %v408_v32  ;;  %459 = vadd.xlane.f32.xlu0 %v458_v38  ;;  %456 = vadd.xlane.f32.xlu2 %v455_v39  ;;  %v470_v25 = vsel %vm331_vm3, %v1396_v37, 0.0  ;;  %v1404_v42 = vpop.eup %1005 }
 0x133   :  { %1009 = vpow2.f32 %v418_v33  ;;  %v434_v53 = vsel %vm331_vm3, %v1404_v42, 0.0 }
 0x134   :  { %471 = vadd.xlane.f32.xlu1 %v470_v25  ;;  %1011 = vpow2.f32 %v426_v26 }
 0x135   :  { %v355_v23 = vpop.xlane.xlu0 %354  ;;  %v343_v41 = vpop.xlane.xlu2 %342 }
 0x136   :  { %v387_v43 = vsub.f32 %v1340_v34, %v355_v23  ;;  %v383_v44 = vsub.f32 %v1344_v35, %v343_v41 }
 0x138   :  { %v1408_v45 = vpop.eup %1007  ;;  %v410_v47 = vmul.f32 1.442695, %v387_v43  ;;  %v402_v49 = vmul.f32 1.442695, %v383_v44 }
 0x139   :  { %v1410_v50 = vpop.eup %1009  ;;  %v446_v51 = vsel %vm331_vm3, %v1408_v45, 0.0 }
 0x13a   :  { %1013 = vpow2.f32 %v410_v47  ;;  %447 = vadd.xlane.f32.xlu0 %v446_v51  ;;  %435 = vadd.xlane.f32.xlu2 %v434_v53  ;;  %v461_v34 = vsel %vm331_vm3, %v1410_v50, 0.0  ;;  %v1418_v35 = vpop.eup %1011 }
 0x13b   :  { %1015 = vpow2.f32 %v402_v49  ;;  %v473_v55 = vsel %vm331_vm3, %v1418_v35, 0.0 }
 0x13c   :  { %462 = vadd.xlane.f32.xlu1 %v461_v34 }
 0x140   :  { %v1420_v54 = vpop.eup %1013 }
 0x141   :  { %v1422_v29 = vpop.eup %1015  ;;  %v449_v57 = vsel %vm331_vm3, %v1420_v54, 0.0 }
 0x142   :  { %474 = vadd.xlane.f32.xlu2 %v473_v55  ;;  %v437_v56 = vsel %vm331_vm3, %v1422_v29, 0.0 }
 0x143   :  { %438 = vadd.xlane.f32.xlu0 %v437_v56 }
 0x144   :  { %450 = vadd.xlane.f32.xlu1 %v449_v57 }
 0x187   :  { %v430_v62 = vpop.xlane.xlu0 %429 }
 0x188   :  { %1017 = vrcp.f32 %v430_v62  ;;  %v487_v7 = vand.u32 2147483648, %v430_v62  ;;  %v485_v0 = vand.u32 2147483647, %v430_v62  ;;  %vm481_vm11 = vweird.f32 %v430_v62 }
 0x18a   :  { %v488_v58 = vor.u32 1.1754944e-38, %v487_v7  ;;  %vm486_vm13 = vcmp.eq.f32.partialorder %v485_v0, 8.507059e+37 }
 0x18e   :  { %v1018_v63 = vpop.eup %1017 }
 0x18f   :  { %v477_v52 = vmul.f32 %v1018_v63, %v430_v62  ;;  %v442_v3 = vpop.xlane.xlu1 %441  ;;  %vm482_vm10 = vweird.f32 %v1018_v63 }
 0x190   :  { %1019 = vrcp.f32 %v442_v3  ;;  %vm483_vm12 = vmor %vm481_vm11, %vm482_vm10  ;;  %v543_v21 = vand.u32 2147483648, %v442_v3  ;;  %v541_v22 = vand.u32 2147483647, %v442_v3  ;;  %vm537_vm15 = vweird.f32 %v442_v3 }
 0x191   :  { %v478_v5 = vsub.f32 1.0, %v477_v52 }
 0x192   :  { %v544_v26 = vor.u32 1.1754944e-38, %v543_v21  ;;  %vm542_vm2 = vcmp.eq.f32.partialorder %v541_v22, 8.507059e+37 }
 0x193   :  { %v479_v6 = vmul.f32 %v1018_v63, %v478_v5 }
 0x195   :  { %v480_v1 = vadd.f32 %v1018_v63, %v479_v6  ;;  %v1430_v8 = vpop.xlane.xlu2 %465 }
 0x196   :  { %v1020_v9 = vpop.eup %1019  ;;  %1021 = vrcp.f32 %v1430_v8  ;;  %v653_v32 = vand.u32 2147483647, %v1430_v8  ;;  %v655_v33 = vand.u32 2147483648, %v1430_v8  ;;  %vm649_vm4 = vweird.f32 %v1430_v8 }
 0x197   :  { %v533_v11 = vmul.f32 %v1020_v9, %v442_v3  ;;  %v1433_v15 = vpop.xlane.xlu1 %453  ;;  %v484_v16 = vsel %vm483_vm12, %v1018_v63, %v480_v1  ;;  %vm538_vm14 = vweird.f32 %v1020_v9 }
 0x198   :  { %1023 = vrcp.f32 %v1433_v15  ;;  %v489_v19 = vsel %vm486_vm13, %v488_v58, %v484_v16  ;;  %vm539_vm1 = vmor %vm537_vm15, %vm538_vm14  ;;  %v597_v23 = vand.u32 2147483647, %v1433_v15  ;;  %v599_v41 = vand.u32 2147483648, %v1433_v15 }
 0x199   :  { %v534_v17 = vsub.f32 1.0, %v533_v11  ;;  %v700_v20 = vmul.f32 %v1353_v48, %v489_v19  ;;  %vm1465_vm5 = vcmp.eq.f32.partialorder %v653_v32, 8.507059e+37  ;;  %v656_v51 = vor.u32 1.1754944e-38, %v655_v33 }
 0x19a   :  { %vm593_vm7 = vweird.f32 %v1433_v15  ;;  %vm1476_vm8 = vcmp.eq.f32.partialorder %v597_v23, 8.507059e+37  ;;  %v600_v59 = vor.u32 1.1754944e-38, %v599_v41 }
 0x19b   :  { %v535_v13 = vmul.f32 %v1020_v9, %v534_v17  ;;  %962 = vmatmul.msk.f32.vlgmr.msrb.gmra.mxu0 %vm331_vm3, %v700_v20  ;;  %900 = vst.msk [vmem:[%s1924_s5] sm:$0xff] %vm331_vm3, %v700_v20 }
 0x19c   :  { %v1437_v14 = vpop.eup %1021 }
 0x19d   :  { %v536_v4 = vadd.f32 %v1020_v9, %v535_v13  ;;  %v645_v27 = vmul.f32 %v1437_v14, %v1430_v8  ;;  %v1446_v28 = vpop.xlane.xlu0 %468  ;;  %v1448_v48 = vpop.xlane.xlu2 %444  ;;  %vm650_vm6 = vweird.f32 %v1437_v14 }
 0x19e   :  { %v1450_v31 = vpop.eup %1023  ;;  %1025 = vrcp.f32 %v1446_v28  ;;  %v669_v60 = vand.u32 2147483648, %v1446_v28  ;;  %vm1503_vm10 = vmor %vm649_vm4, %vm650_vm6  ;;  %v555_v1 = vand.u32 2147483647, %v1448_v48  ;;  %vm663_vm11 = vweird.f32 %v1446_v28 }
 0x19f   :  { %v646_v38 = vsub.f32 1.0, %v645_v27  ;;  %v589_v39 = vmul.f32 %v1450_v31, %v1433_v15  ;;  %1027 = vrcp.f32 %v1448_v48  ;;  %v1458_v25 = vpop.xlane.xlu1 %432  ;;  %v540_v47 = vsel %vm539_vm1, %v1020_v9, %v536_v4 }
 0x1a0   :  { %1029 = vrcp.f32 %v1458_v25  ;;  %v545_v53 = vsel %vm542_vm2, %v544_v26, %v540_v47  ;;  %vm594_vm9 = vweird.f32 %v1450_v31  ;;  %v501_v63 = vand.u32 2147483648, %v1458_v25 }
 0x1a1   :  { %v647_v43 = vmul.f32 %v1437_v14, %v646_v38  ;;  %v590_v44 = vsub.f32 1.0, %v589_v39  ;;  %v704_v56 = vmul.f32 %v1359_v36, %v545_v53  ;;  %v557_v36 = vand.u32 2147483648, %v1448_v48  ;;  %vm595_vm13 = vmor %vm593_vm7, %vm594_vm9 }
 0x1a2   :  { %v1521_v16 = vor.u32 1.1754944e-38, %v669_v60  ;;  %vm551_vm12 = vweird.f32 %v1448_v48  ;;  %v1529_v13 = vor.u32 1.1754944e-38, %v501_v63  ;;  %v667_v21 = vand.u32 2147483647, %v1446_v28 }
 0x1a3   :  { %v648_v34 = vadd.f32 %v1437_v14, %v647_v43  ;;  %v591_v55 = vmul.f32 %v1450_v31, %v590_v44  ;;  %966 = vmatmul.msk.f32.vlgmr.msrb.gmra.mxu1 %vm331_vm3, %v704_v56  ;;  %904 = vst.msk [vmem:[%s1924_s5 + $0x20] sm:$0xff] %vm331_vm3, %v704_v56  ;;  %v558_v19 = vor.u32 1.1754944e-38, %v557_v36  ;;  %vm495_vm14 = vweird.f32 %v1458_v25 }
 0x1a4   :  { %v1473_v57 = vpop.eup %1025  ;;  %vm1542_vm15 = vcmp.eq.f32.partialorder %v555_v1, 8.507059e+37  ;;  %vm1584_vm4 = vcmp.eq.f32.partialorder %v667_v21, 8.507059e+37 }
 0x1a5   :  { %v1481_v61 = vpop.eup %1027  ;;  %v659_v62 = vmul.f32 %v1473_v57, %v1446_v28  ;;  %v1493_v52 = vpop.xlane.xlu0 %459  ;;  %v592_v7 = vadd.f32 %v1450_v31, %v591_v55  ;;  %v652_v11 = vsel %vm1503_vm10, %v1437_v14, %v648_v34  ;;  %vm664_vm1 = vweird.f32 %v1473_v57 }
 0x1a6   :  { %v1495_v3 = vpop.xlane.xlu2 %456  ;;  %v1497_v5 = vpop.eup %1029  ;;  %v547_v0 = vmul.f32 %v1481_v61, %v1448_v48  ;;  %1031 = vrcp.f32 %v1493_v52  ;;  %v657_v22 = vsel %vm1465_vm5, %v656_v51, %v652_v11  ;;  %v627_v26 = vand.u32 2147483648, %v1493_v52  ;;  %vm1594_vm5 = vmor %vm663_vm11, %vm664_vm1 }
 0x1a7   :  { %v660_v9 = vsub.f32 1.0, %v659_v62  ;;  %v491_v58 = vmul.f32 %v1497_v5, %v1458_v25  ;;  %1033 = vrcp.f32 %v1495_v3  ;;  %v1516_v8 = vpop.xlane.xlu1 %471  ;;  %v596_v27 = vsel %vm595_vm13, %v1450_v31, %v592_v7 }
 0x1a8   :  { %v548_v17 = vsub.f32 1.0, %v547_v0  ;;  %1035 = vrcp.f32 %v1516_v8  ;;  %v712_v32 = vmul.f32 %v1367_v2, %v657_v22  ;;  %v601_v33 = vsel %vm1476_vm8, %v600_v59, %v596_v27 }
 0x1a9   :  { %v492_v20 = vsub.f32 1.0, %v491_v58  ;;  %v661_v14 = vmul.f32 %v1473_v57, %v660_v9  ;;  %v708_v23 = vmul.f32 %v1365_v46, %v601_v33  ;;  %v499_v31 = vand.u32 2147483647, %v1458_v25 }
 0x1aa   :  { %v549_v4 = vmul.f32 %v1481_v61, %v548_v17  ;;  %v613_v43 = vand.u32 2147483648, %v1495_v3  ;;  %v683_v44 = vand.u32 2147483648, %v1516_v8  ;;  %974 = vmatmul.msk.f32.vlgmr.msrb.gmra.mxu3 %vm331_vm3, %v712_v32  ;;  %912 = vst.msk [vmem:[%s1924_s5 + $0x60] sm:$0xff] %vm331_vm3, %v712_v32  ;;  %vm552_vm2 = vweird.f32 %v1481_v61 }
 0x1ab   :  { %v493_v15 = vmul.f32 %v1497_v5, %v492_v20  ;;  %970 = vmatmul.msk.f32.vlgmr.msrb.gmra.mxu2 %vm331_vm3, %v708_v23  ;;  %908 = vst.msk [vmem:[%s1924_s5 + $0x40] sm:$0xff] %vm331_vm3, %v708_v23  ;;  %v662_v34 = vadd.f32 %v1473_v57, %v661_v14  ;;  %vm496_vm6 = vweird.f32 %v1497_v5  ;;  %v1599_v63 = vor.u32 1.1754944e-38, %v627_v26  ;;  %vm553_vm7 = vmor %vm551_vm12, %vm552_vm2 }
 0x1ac   :  { %v1546_v39 = vpop.eup %1031  ;;  %v550_v49 = vadd.f32 %v1481_v61, %v549_v4  ;;  %v1601_v6 = vor.u32 1.1754944e-38, %v613_v43  ;;  %v1605_v0 = vor.u32 1.1754944e-38, %v683_v44  ;;  %vm607_vm8 = vweird.f32 %v1495_v3  ;;  %vm497_vm10 = vmor %vm495_vm14, %vm496_vm6 }
 0x1ad   :  { %v1552_v41 = vpop.eup %1033  ;;  %v617_v2 = vmul.f32 %v1546_v39, %v1493_v52  ;;  %v1563_v46 = vpop.xlane.xlu0 %447  ;;  %v494_v59 = vadd.f32 %v1497_v5, %v493_v15  ;;  %v666_v9 = vsel %vm1594_vm5, %v1473_v57, %v662_v34  ;;  %vm500_vm9 = vcmp.eq.f32.partialorder %v499_v31, 8.507059e+37 }
 0x1ae   :  { %v1565_v47 = vpop.xlane.xlu2 %435  ;;  %v1568_v51 = vpop.eup %1035  ;;  %v603_v53 = vmul.f32 %v1552_v41, %v1495_v3  ;;  %1037 = vrcp.f32 %v1563_v46  ;;  %v571_v55 = vand.u32 2147483648, %v1563_v46  ;;  %v554_v1 = vsel %vm553_vm7, %v1481_v61, %v550_v49 }
 0x1af   :  { %1039 = vrcp.f32 %v1565_v47  ;;  %v1582_v56 = vpop.xlane.xlu1 %462  ;;  %v618_v60 = vsub.f32 1.0, %v617_v2  ;;  %v673_v7 = vmul.f32 %v1568_v51, %v1516_v8  ;;  %v515_v11 = vand.u32 2147483648, %v1565_v47 }
 0x1b0   :  { %v604_v62 = vsub.f32 1.0, %v603_v53  ;;  %1041 = vrcp.f32 %v1582_v56  ;;  %v1617_v58 = vor.u32 1.1754944e-38, %v571_v55  ;;  %v559_v17 = vsel %vm1542_vm15, %v558_v19, %v554_v1 }
 0x1b1   :  { %v671_v48 = vsel %vm1584_vm4, %v1521_v16, %v666_v9  ;;  %v1632_v57 = vmul.f32 %v1546_v39, %v618_v60  ;;  %v705_v20 = vmul.f32 %v1374_v10, %v559_v17  ;;  %v498_v19 = vsel %vm497_vm10, %v1497_v5, %v494_v59 }
 0x1b2   :  { %v605_v28 = vmul.f32 %v1552_v41, %v604_v62  ;;  %v713_v21 = vmul.f32 %v1378_v12, %v671_v48  ;;  %v674_v4 = vsub.f32 1.0, %v673_v7  ;;  %v503_v25 = vsel %vm500_vm9, %v1529_v13, %v498_v19 }
 0x1b3   :  { %v641_v12 = vand.u32 2147483648, %v1582_v56  ;;  %967 = vmatmul.msk.f32.gmra.mxu1 %vm331_vm3, %v705_v20  ;;  %905 = vst.msk [vmem:[%s1924_s5 + $0x28] sm:$0xff] %vm331_vm3, %v705_v20  ;;  %v701_v5 = vmul.f32 %v1381_v18, %v503_v25  ;;  %vm677_vm11 = vweird.f32 %v1516_v8  ;;  %vm608_vm12 = vweird.f32 %v1552_v41 }
 0x1b4   :  { %v1629_v61 = vpop.eup %1037  ;;  %v606_v27 = vadd.f32 %v1552_v41, %v605_v28  ;;  %975 = vmatmul.msk.f32.gmra.mxu3 %vm331_vm3, %v713_v21  ;;  %913 = vst.msk [vmem:[%s1924_s5 + $0x68] sm:$0xff] %vm331_vm3, %v713_v21  ;;  %v611_v31 = vand.u32 2147483647, %v1495_v3  ;;  %v675_v2 = vmul.f32 %v1568_v51, %v674_v4  ;;  %vm509_vm13 = vweird.f32 %v1565_v47  ;;  %vm609_vm15 = vmor %vm607_vm8, %vm608_vm12 }
 0x1b5   :  { %v1637_v14 = vpop.eup %1039  ;;  %v561_v16 = vmul.f32 %v1629_v61, %v1563_v46  ;;  %963 = vmatmul.msk.f32.gmra.mxu0 %vm331_vm3, %v701_v5  ;;  %901 = vst.msk [vmem:[%s1924_s5 + $0x8] sm:$0xff] %vm331_vm3, %v701_v5  ;;  %v1681_v43 = vor.u32 1.1754944e-38, %v515_v11  ;;  %v1685_v53 = vor.u32 1.1754944e-38, %v641_v12  ;;  %vm565_vm1 = vweird.f32 %v1563_v46 }
 0x1b6   :  { %v1642_v22 = vpop.xlane.xlu2 %474  ;;  %v1645_v15 = vpop.eup %1041  ;;  %v505_v10 = vmul.f32 %v1637_v14, %v1565_v47  ;;  %v610_v1 = vsel %vm609_vm15, %v1552_v41, %v606_v27  ;;  %vm612_vm2 = vcmp.eq.f32.partialorder %v611_v31, 8.507059e+37  ;;  %vm621_vm4 = vweird.f32 %v1493_v52 }
 0x1b7   :  { %v1657_v13 = vpop.xlane.xlu0 %438  ;;  %1043 = vrcp.f32 %v1642_v22  ;;  %v562_v32 = vsub.f32 1.0, %v561_v16  ;;  %v631_v33 = vmul.f32 %v1645_v15, %v1582_v56  ;;  %v1668_v38 = vpop.xlane.xlu1 %450  ;;  %v697_v23 = vand.u32 2147483648, %v1642_v22 }
 0x1b8   :  { %1045 = vrcp.f32 %v1657_v13  ;;  %v506_v18 = vsub.f32 1.0, %v505_v10  ;;  %v529_v26 = vand.u32 2147483648, %v1657_v13  ;;  %v527_v34 = vand.u32 2147483647, %v1657_v13 }
 0x1b9   :  { %v632_v44 = vsub.f32 1.0, %v631_v33  ;;  %1047 = vrcp.f32 %v1668_v38  ;;  %v563_v49 = vmul.f32 %v1629_v61, %v562_v32  ;;  %v695_v55 = vand.u32 2147483647, %v1642_v22 }
 0x1ba   :  { %v507_v40 = vmul.f32 %v1637_v14, %v506_v18  ;;  %vm523_vm14 = vweird.f32 %v1657_v13  ;;  %v1694_v60 = vor.u32 1.1754944e-38, %v529_v26  ;;  %v1696_v62 = vor.u32 1.1754944e-38, %v697_v23 }
 0x1bb   :  { %v1691_v59 = vmul.f32 %v1645_v15, %v632_v44  ;;  %v583_v7 = vand.u32 2147483647, %v1668_v38  ;;  %v585_v28 = vand.u32 2147483648, %v1668_v38  ;;  %v615_v3 = vsel %vm612_vm2, %v1601_v6, %v610_v1 }
 0x1bc   :  { %v676_v17 = vadd.f32 %v1568_v51, %v675_v2  ;;  %vm1719_vm7 = vcmp.eq.f32.partialorder %v527_v34, 8.507059e+37  ;;  %vm691_vm8 = vweird.f32 %v1642_v22  ;;  %v709_v21 = vmul.f32 %v1389_v24, %v615_v3 }
 0x1bd   :  { %v1702_v36 = vpop.eup %1043  ;;  %v1724_v20 = vor.u32 1.1754944e-38, %v585_v28  ;;  %vm678_vm10 = vweird.f32 %v1568_v51  ;;  %v681_v4 = vand.u32 2147483647, %v1516_v8  ;;  %v508_v16 = vadd.f32 %v1637_v14, %v507_v40 }
 0x1be   :  { %v1708_v9 = vpop.eup %1045  ;;  %v687_v11 = vmul.f32 %v1702_v36, %v1642_v22  ;;  %vm692_vm5 = vweird.f32 %v1702_v36  ;;  %971 = vmatmul.msk.f32.gmra.mxu2 %vm331_vm3, %v709_v21  ;;  %909 = vst.msk [vmem:[%s1924_s5 + $0x48] sm:$0xff] %vm331_vm3, %v709_v21  ;;  %vm679_vm2 = vmor %vm677_vm11, %vm678_vm10  ;;  %vm510_vm0 = vweird.f32 %v1637_v14  ;;  %vm1746_vm12 = vcmp.eq.f32.partialorder %v695_v55, 8.507059e+37 }
 0x1bf   :  { %v519_v48 = vmul.f32 %v1708_v9, %v1657_v13  ;;  %vm524_vm6 = vweird.f32 %v1708_v9  ;;  %v1727_v19 = vpop.eup %1047  ;;  %v680_v12 = vsel %vm679_vm2, %v1568_v51, %v676_v17  ;;  %vm682_vm9 = vcmp.eq.f32.partialorder %v681_v4, 8.507059e+37  ;;  %vm511_vm11 = vmor %vm509_vm13, %vm510_vm0 }
 0x1c0   :  { %v688_v6 = vsub.f32 1.0, %v687_v11  ;;  %v575_v27 = vmul.f32 %v1727_v19, %v1668_v38  ;;  %v513_v5 = vand.u32 2147483647, %v1565_v47  ;;  %vm1753_vm15 = vcmp.eq.f32.partialorder %v583_v7, 8.507059e+37  ;;  %vm1769_vm2 = vmor %vm523_vm14, %vm524_vm6 }
 0x1c1   :  { %v520_v25 = vsub.f32 1.0, %v519_v48  ;;  %v685_v8 = vsel %vm682_vm9, %v1605_v0, %v680_v12  ;;  %v564_v26 = vadd.f32 %v1629_v61, %v563_v49  ;;  %v512_v31 = vsel %vm511_vm11, %v1637_v14, %v508_v16 }
 0x1c2   :  { %v689_v24 = vmul.f32 %v1702_v36, %v688_v6  ;;  %v576_v33 = vsub.f32 1.0, %v575_v27  ;;  %v714_v51 = vmul.f32 %v1396_v37, %v685_v8  ;;  %vm514_vm10 = vcmp.eq.f32.partialorder %v513_v5, 8.507059e+37 }
 0x1c3   :  { %v521_v32 = vmul.f32 %v1708_v9, %v520_v25  ;;  %v517_v44 = vsel %vm514_vm10, %v1681_v43, %v512_v31  ;;  %vm566_vm0 = vweird.f32 %v1629_v61  ;;  %v569_v13 = vand.u32 2147483647, %v1563_v46 }
 0x1c4   :  { %v690_v23 = vadd.f32 %v1702_v36, %v689_v24  ;;  %v577_v47 = vmul.f32 %v1727_v19, %v576_v33  ;;  %976 = vmatmul.msk.f32.gmra.mxu3 %vm331_vm3, %v714_v51  ;;  %914 = vst.msk [vmem:[%s1924_s5 + $0x70] sm:$0xff] %vm331_vm3, %v714_v51  ;;  %v702_v37 = vmul.f32 %v1404_v42, %v517_v44  ;;  %vm1784_vm13 = vmor %vm565_vm1, %vm566_vm0  ;;  %vm622_vm14 = vweird.f32 %v1546_v39 }
 0x1c5   :  { %v522_v2 = vadd.f32 %v1708_v9, %v521_v32  ;;  %v620_v43 = vadd.f32 %v1546_v39, %v1632_v57  ;;  %v568_v34 = vsel %vm1784_vm13, %v1629_v61, %v564_v26  ;;  %vm1798_vm6 = vmor %vm621_vm4, %vm622_vm14  ;;  %v625_v55 = vand.u32 2147483647, %v1493_v52 }
 0x1c6   :  { %v578_v49 = vadd.f32 %v1727_v19, %v577_v47  ;;  %vm1810_vm1 = vmor %vm691_vm8, %vm692_vm5  ;;  %964 = vmatmul.msk.f32.gmra.mxu0 %vm331_vm3, %v702_v37  ;;  %902 = vst.msk [vmem:[%s1924_s5 + $0x10] sm:$0xff] %vm331_vm3, %v702_v37  ;;  %vm570_vm4 = vcmp.eq.f32.partialorder %v569_v13, 8.507059e+37  ;;  %v634_v22 = vadd.f32 %v1645_v15, %v1691_v59  ;;  %vm1960_vm5 = vweird.f32 %v1727_v19 }
 0x1c7   :  { %v526_v46 = vsel %vm1769_vm2, %v1708_v9, %v522_v2  ;;  %v624_v52 = vsel %vm1798_vm6, %v1546_v39, %v620_v43  ;;  %vm1961_vm8 = vweird.f32 %v1668_v38  ;;  %v573_v7 = vsel %vm570_vm4, %v1617_v58, %v568_v34 }
 0x1c8   :  { %v531_v61 = vsel %vm1719_vm7, %v1694_v60, %v526_v46  ;;  %vm1831_vm9 = vmor %vm1961_vm8, %vm1960_vm5  ;;  %vm626_vm11 = vcmp.eq.f32.partialorder %v625_v55, 8.507059e+37  ;;  %vm636_vm10 = vweird.f32 %v1645_v15  ;;  %v706_v60 = vmul.f32 %v1408_v45, %v573_v7 }
 0x1c9   :  { %v703_v39 = vmul.f32 %v1422_v29, %v531_v61  ;;  %v629_v28 = vsel %vm626_vm11, %v1599_v63, %v624_v52  ;;  %vm1964_vm7 = vweird.f32 %v1582_v56  ;;  %v639_v38 = vand.u32 2147483647, %v1582_v56 }
 0x1ca   :  { %vm1842_vm2 = vmor %vm1964_vm7, %vm636_vm10  ;;  %v694_v58 = vsel %vm1810_vm1, %v1702_v36, %v690_v23  ;;  %v710_v29 = vmul.f32 %v1393_v30, %v629_v28  ;;  %v582_v56 = vsel %vm1831_vm9, %v1727_v19, %v578_v49  ;;  %968 = vmatmul.msk.f32.gmra.mxu1 %vm331_vm3, %v706_v60  ;;  %906 = vst.msk [vmem:[%s1924_s5 + $0x30] sm:$0xff] %vm331_vm3, %v706_v60 }
 0x1cb   :  { %903 = vst.msk [vmem:[%s1924_s5 + $0x18] sm:$0xff] %vm331_vm3, %v703_v39  ;;  %v638_v45 = vsel %vm1842_vm2, %v1645_v15, %v634_v22  ;;  %v699_v63 = vsel %vm1746_vm12, %v1696_v62, %v694_v58  ;;  %vm640_vm0 = vcmp.eq.f32.partialorder %v639_v38, 8.507059e+37  ;;  %v587_v15 = vsel %vm1753_vm15, %v1724_v20, %v582_v56 }
 0x1cc   :  { %v715_v30 = vmul.f32 %v1418_v35, %v699_v63  ;;  %972 = vmatmul.msk.f32.gmra.mxu2 %vm331_vm3, %v710_v29  ;;  %910 = vst.msk [vmem:[%s1924_s5 + $0x50] sm:$0xff] %vm331_vm3, %v710_v29  ;;  %v643_v62 = vsel %vm640_vm0, %v1685_v53, %v638_v45  ;;  %v707_v36 = vmul.f32 %v1420_v54, %v587_v15  ;;  %vm1967_vm12 = vcmask 261120  }
 0x1cd   :  { %v711_v1 = vmul.f32 %v1410_v50, %v643_v62  ;;  %vm1968_vm15 = vmmov %vm1967_vm12 }
 0x1ce   :  { %977 = vmatmul.msk.f32.gmra.mxu3 %vm331_vm3, %v715_v30  ;;  %915 = vst.msk [vmem:[%s1924_s5 + $0x78] sm:$0xff] %vm331_vm3, %v715_v30  ;;  %965 = vmatmul.msk.f32.gmra.mxu0 %vm331_vm3, %v703_v39  ;;  %vm1969_vm13 = vmmov %vm1967_vm12 }
 0x1cf   :  { %907 = vst.msk [vmem:[%s1924_s5 + $0x38] sm:$0xff] %vm331_vm3, %v707_v36  ;;  %vm1970_vm14 = vmmov %vm1967_vm12 }
 0x1d0   :  { %911 = vst.msk [vmem:[%s1924_s5 + $0x58] sm:$0xff] %vm331_vm3, %v711_v1  ;;  %vm1971_vm6 = vmmov %vm1967_vm12  ;;  %s1157_s5 = smov [#allocation8]  }
 0x1d1   :  { %vm1972_vm1 = vmmov %vm1971_vm6  ;;  %s920_s19 = sshll.u32 %s1157_s5, 4  ;;  %s921_s19 = int_to_ptr.vmem [resolvable:$true] %s920_s19 }
 0x1d2   :  { %969 = vmatmul.msk.f32.gmra.mxu1 %vm331_vm3, %v707_v36  ;;  %vm1974_vm4 = vmmov %vm1972_vm1 }
 0x1d3   :  { %vm1975_vm5 = vmmov %vm1972_vm1 }
 0x1d4   :  { %973 = vmatmul.msk.f32.gmra.mxu2 %vm331_vm3, %v711_v1  ;;  %vm1973_vm3 = vmmov %vm1972_vm1 }
 0x1d5   :  { %vm1976_vm8 = vmmov %vm1972_vm1 }
 0x1d6   :  { %vm1977_vm9 = vmmov %vm1972_vm1 }
 0x1d7   :  { %vm1978_vm11 = vmmov %vm1972_vm1 }
 0x1d8   :  { %vm1979_vm10 = vmmov %vm1972_vm1 }
 0x1d9   :  { %vm1980_vm7 = vmmov %vm1972_vm1 }
 0x1da   :  { %vm1981_vm2 = vmmov %vm1972_vm1 }
 0x1db   :  { %vm1982_vm0 = vmmov %vm1972_vm1 }
 0x218   :  { %v749_v50 = vpop.f32.mrf.mxu0 }
 0x219   :  { %884 = vst.msk [vmem:[#allocation8] sm:$0xff] %vm1967_vm12, %v749_v50 }
 0x220   :  { %v790_v35 = vpop.f32.mrf.mxu1 }
 0x221   :  { %888 = vst.msk [vmem:[#allocation8 + $0x20] sm:$0xff] %vm1968_vm15, %v790_v35 }
 0x22d   :  { %v872_v54 = vpop.f32.mrf.mxu3 }
 0x22e   :  { %896 = vst.msk [vmem:[#allocation8 + $0x60] sm:$0xff] %vm1969_vm13, %v872_v54  ;;  %v831_v53 = vpop.f32.mrf.mxu2 }
 0x22f   :  { %892 = vst.msk [vmem:[#allocation8 + $0x40] sm:$0xff] %vm1970_vm14, %v831_v53 }
 0x230   :  { %v793_v9 = vpop.f32.mrf.mxu1 }
 0x231   :  { %889 = vst.msk [vmem:[#allocation8 + $0x28] sm:$0xff] %vm1971_vm6, %v793_v9 }
 0x232   :  { %v752_v11 = vpop.f32.mrf.mxu0 }
 0x233   :  { %885 = vst.msk [vmem:[#allocation8 + $0x8] sm:$0xff] %vm1972_vm1, %v752_v11 }
 0x237   :  { %v875_v3 = vpop.f32.mrf.mxu3 }
 0x238   :  { %897 = vst.msk [vmem:[#allocation8 + $0x68] sm:$0xff] %vm1973_vm3, %v875_v3 }
 0x241   :  { %v834_v17 = vpop.f32.mrf.mxu2 }
 0x242   :  { %893 = vst.msk [vmem:[#allocation8 + $0x48] sm:$0xff] %vm1974_vm4, %v834_v17 }
 0x243   :  { %v755_v48 = vpop.f32.mrf.mxu0 }
 0x244   :  { %886 = vst.msk [vmem:[#allocation8 + $0x10] sm:$0xff] %vm1975_vm5, %v755_v48 }
 0x247   :  { %v796_v41 = vpop.f32.mrf.mxu1  ;;  %v878_v20 = vpop.f32.mrf.mxu3 }
 0x248   :  { %890 = vst.msk [vmem:[#allocation8 + $0x30] sm:$0xff] %vm1976_vm8, %v796_v41 }
 0x249   :  { %898 = vst.msk [vmem:[#allocation8 + $0x70] sm:$0xff] %vm1977_vm9, %v878_v20 }
 0x24b   :  { %v758_v21 = vpop.f32.mrf.mxu0 }
 0x24c   :  { %887 = vst.msk [vmem:[#allocation8 + $0x18] sm:$0xff] %vm1978_vm11, %v758_v21 }
 0x24f   :  { %v837_v19 = vpop.f32.mrf.mxu2  ;;  %v799_v6 = vpop.f32.mrf.mxu1 }
 0x250   :  { %894 = vst.msk [vmem:[#allocation8 + $0x50] sm:$0xff] %vm1979_vm10, %v837_v19 }
 0x251   :  { %v881_v4 = vpop.f32.mrf.mxu3  ;;  %891 = vst.msk [vmem:[#allocation8 + $0x38] sm:$0xff] %vm1980_vm7, %v799_v6 }
 0x252   :  { %899 = vst.msk [vmem:[#allocation8 + $0x78] sm:$0xff] %vm1981_vm2, %v881_v4 }
 0x257   :  { %v840_v16 = vpop.f32.mrf.mxu2 }
 0x258   :  { %895 = vst.msk [vmem:[#allocation8 + $0x58] sm:$0xff] %vm1982_vm0, %v840_v16 }
 0x259   :  { %928 = dma.vmem_to_hbm [thread:$0]  %s921_s19, 2048, %s923_s22, [#allocation4], %s1152_s26, %s1152_s26, %s1153_s27  }
 0x25a   :  { %1149 = dma.done.wait [#allocation4], 2048  }
 0x25b   :  { %1150 = vsyncadd [#allocation4], 4294965248 }
 0x25c   :  { %937 = vsyncpa [#allocation3], 1 }
 0x25d   :  { %938 = vsyncpa [#allocation6], 1 }
 0x25e   :  { %939 = vsyncpa [#allocation4], 1 }

// kernel: tpu_custom_call.1
= control target key start
LH: loop header
LB: loop body
LE: loop exit
PB: predicated region body
PF: predicated region fallthrough
CT: control target
= control target key end

     0   :  { %11 = vsyncpa [#allocation3], 0  ;;  %s1919_s0 = inlined_call_operand.hbm [shape: f32[4,32,32], index: 0, kind: input, shape index: {}]   ;;  %s1920_s1 = inlined_call_operand.hbm [shape: f32[4,8,32], index: 1, kind: input, shape index: {}]   ;;  %s1921_s2 = inlined_call_operand.hbm [shape: f32[4,8,32], index: 2, kind: input, shape index: {}]   ;;  %s1922_s3 = inlined_call_operand.vmem [shape: s8[32,8], index: 3, kind: input, shape index: {}]   ;;  %s1923_s4 = inlined_call_operand.hbm [shape: f32[4,32,32], index: 4, kind: output, shape index: {0}]   ;;  %s1924_s5 = inlined_call_operand.vmem [shape: f32[4,32,8], index: 5, kind: output, shape index: {1}]  }
   0x1   :  { %12 = vsyncpa [#allocation6], 0 }
   0x2   :  { %13 = vsyncpa [#allocation4], 0  ;;  %s31_s20 = sshll.u32 %s1920_s1, 4  ;;  %s1151_s21 = smov [#allocation5]   ;;  %s32_s20 = int_to_ptr.hbm [resolvable:$true] %s31_s20 }
   0x3   :  { %s33_s22 = sshll.u32 %s1151_s21, 4  ;;  %s18_s25 = sshll.u32 %s1919_s0, 4  ;;  %s34_s22 = int_to_ptr.vmem [resolvable:$true] %s33_s22  ;;  %s19_s25 = int_to_ptr.hbm [resolvable:$true] %s18_s25 }
   0x4   :  { %s1152_s26 = smov 128   ;;  %s1153_s27 = smov 8  }
   0x5   :  { %39 = dma.hbm_to_vmem [thread:$0]  %s32_s20, 512, %s34_s22, [#allocation6], %s1152_s26, %s1152_s26, %s1153_s27  }
   0x6   :  { %s1154_s28 = smov [#allocation2]   ;;  %s44_s1 = sshll.u32 %s1921_s2, 4  ;;  %s45_s1 = int_to_ptr.hbm [resolvable:$true] %s44_s1 }
   0x7   :  { %s20_s29 = sshll.u32 %s1154_s28, 4  ;;  %s1155_s0 = smov [#allocation7]   ;;  %s21_s29 = int_to_ptr.vmem [resolvable:$true] %s20_s29 }
   0x8   :  { %26 = dma.hbm_to_vmem [thread:$0]  %s19_s25, 2048, %s21_s29, [#allocation3], %s1152_s26, %s1152_s26, %s1153_s27  }
   0x9   :  { %s46_s7 = sshll.u32 %s1155_s0, 4  ;;  %s47_s7 = int_to_ptr.vmem [resolvable:$true] %s46_s7 }
   0xa   :  { %52 = dma.hbm_to_vmem [thread:$0]  %s45_s1, 512, %s47_s7, [#allocation6], %s1152_s26, %s1152_s26, %s1153_s27  }
   0xb   :  { %1145 = dma.done.wait [#allocation3], 2048  }
   0xc   :  { %1146 = vsyncadd [#allocation3], 4294965248 }
   0xd   :  { %1147 = dma.done.wait [#allocation6], 1024  }
   0xe   :  { %1148 = vsyncadd [#allocation6], 4294966272  ;;  %vm1925_vm0 = vcmask 261120   ;;  %v85_v0 = vld [vmem:[#allocation5] sm:$0xff]  ;;  %v87_v1 = vld [vmem:[#allocation5 + $0x10] sm:$0xff]  ;;  %v1156_v21 = vmov 0  }
   0xf   :  { %v88_v2 = vld [vmem:[#allocation5 + $0x18] sm:$0xff]  ;;  %942 = vmatpush.xpose.msk.msra.mxu0 %vm1925_vm0, %v85_v0  ;;  %952 = vmatpush.xpose.msk.msra.mxu2 %vm1925_vm0, %v87_v1  ;;  %v69_v3 = vld [vmem:[#allocation2] sm:$0xff]  ;;  %v86_v6 = vld [vmem:[#allocation5 + $0x8] sm:$0xff]  ;;  %vm331_vm3 = vcmask 64512   ;;  %s922_s22 = sshll.u32 %s1923_s4, 4  ;;  %s923_s22 = int_to_ptr.hbm [resolvable:$true] %s922_s22 }
  0x10   :  { %v77_v4 = vld [vmem:[#allocation2 + $0x40] sm:$0xff]  ;;  %957 = vmatpush.xpose.msk.msra.mxu3 %vm1925_vm0, %v88_v2  ;;  %947 = vmatpush.xpose.msk.msra.mxu1 %vm1925_vm0, %v86_v6  ;;  %v78_v8 = vld [vmem:[#allocation2 + $0x48] sm:$0xff]  ;;  %v71_v12 = vld [vmem:[#allocation2 + $0x10] sm:$0xff] }
  0x11   :  { %v81_v5 = vld [vmem:[#allocation2 + $0x60] sm:$0xff]  ;;  %v70_v9 = vld [vmem:[#allocation2 + $0x8] sm:$0xff]  ;;  %v79_v13 = vld [vmem:[#allocation2 + $0x50] sm:$0xff] }
  0x12   :  { %v73_v7 = vld [vmem:[#allocation2 + $0x20] sm:$0xff]  ;;  %943 = vmatmul.msk.f32.vlgmr.msra.gmra.mxu0 %vm1925_vm0, %v69_v3  ;;  %953 = vmatmul.msk.f32.vlgmr.msra.gmra.mxu2 %vm1925_vm0, %v77_v4  ;;  %v82_v10 = vld [vmem:[#allocation2 + $0x68] sm:$0xff]  ;;  %v83_v14 = vld [vmem:[#allocation2 + $0x70] sm:$0xff] }
  0x13   :  { %958 = vmatmul.msk.f32.vlgmr.msra.gmra.mxu3 %vm1925_vm0, %v81_v5  ;;  %948 = vmatmul.msk.f32.vlgmr.msra.gmra.mxu1 %vm1925_vm0, %v73_v7  ;;  %v74_v11 = vld [vmem:[#allocation2 + $0x28] sm:$0xff]  ;;  %v75_v15 = vld [vmem:[#allocation2 + $0x30] sm:$0xff]  ;;  %v80_v16 = vld [vmem:[#allocation2 + $0x58] sm:$0xff] }
  0x14   :  { %v72_v17 = vld [vmem:[#allocation2 + $0x18] sm:$0xff]  ;;  %v287_v20 = vld [vmem:[%s1922_s3] sm:$0x3]  ;;  %v288_v26 = vld [vmem:[%s1922_s3 + $0x2] sm:$0x3] }
  0x15   :  { %v84_v18 = vld [vmem:[#allocation2 + $0x78] sm:$0xff]  ;;  %vm291_vm1 = vnez %v287_v20  ;;  %vm292_vm4 = vnez %v288_v26  ;;  %v289_v37 = vld [vmem:[%s1922_s3 + $0x4] sm:$0x3]  ;;  %v290_v61 = vld [vmem:[%s1922_s3 + $0x6] sm:$0x3] }
  0x16   :  { %v76_v19 = vld [vmem:[#allocation2 + $0x38] sm:$0xff]  ;;  %v295_v22 = vsel %vm291_vm1, 16843009, %v1156_v21  ;;  %v296_v33 = vsel %vm292_vm4, 16843009, %v1156_v21  ;;  %vm293_vm5 = vnez %v289_v37  ;;  %vm294_vm8 = vnez %v290_v61 }
  0x17   :  { %v299_v23 = vunpack.c.0.s8 %v295_v22  ;;  %v300_v44 = vunpack.c.0.s8 %v296_v33  ;;  %v297_v47 = vsel %vm293_vm5, 16843009, %v1156_v21  ;;  %v298_v7 = vsel %vm294_vm8, 16843009, %v1156_v21 }
  0x18   :  { %v301_v55 = vunpack.c.0.s8 %v297_v47 }
  0x19   :  { %vm1229_vm2 = vcmp.ne.s32.totalorder %v299_v23, 0  ;;  %vm1261_vm6 = vcmp.ne.s32.totalorder %v300_v44, 0 }
  0x1a   :  { %954 = vmatmul.msk.f32.gmra.mxu2 %vm1925_vm0, %v78_v8  ;;  %944 = vmatmul.msk.f32.gmra.mxu0 %vm1925_vm0, %v70_v9  ;;  %vm1282_vm7 = vcmp.ne.s32.totalorder %v301_v55, 0 }
  0x1b   :  { %959 = vmatmul.msk.f32.gmra.mxu3 %vm1925_vm0, %v82_v10  ;;  %949 = vmatmul.msk.f32.gmra.mxu1 %vm1925_vm0, %v74_v11  ;;  %v302_v11 = vunpack.c.0.s8 %v298_v7 }
  0x1d   :  { %vm1312_vm9 = vcmp.ne.s32.totalorder %v302_v11, 0 }
  0x22   :  { %945 = vmatmul.msk.f32.gmra.mxu0 %vm1925_vm0, %v71_v12  ;;  %955 = vmatmul.msk.f32.gmra.mxu2 %vm1925_vm0, %v79_v13 }
  0x23   :  { %960 = vmatmul.msk.f32.gmra.mxu3 %vm1925_vm0, %v83_v14  ;;  %950 = vmatmul.msk.f32.gmra.mxu1 %vm1925_vm0, %v75_v15 }
  0x2a   :  { %956 = vmatmul.msk.f32.gmra.mxu2 %vm1925_vm0, %v80_v16  ;;  %946 = vmatmul.msk.f32.gmra.mxu0 %vm1925_vm0, %v72_v17 }
  0x2b   :  { %961 = vmatmul.msk.f32.gmra.mxu3 %vm1925_vm0, %v84_v18  ;;  %951 = vmatmul.msk.f32.gmra.mxu1 %vm1925_vm0, %v76_v19 }
  0x8f   :  { %v122_v24 = vpop.f32.mrf.mxu0 }
  0x90   :  { %v266_v27 = vmul.f32 0.17677669, %v122_v24  ;;  %v166_v28 = vpop.f32.mrf.mxu1 }
  0x91   :  { %v270_v30 = vmul.f32 0.17677669, %v166_v28 }
  0x92   :  { %v1238_v29 = vsel %vm1229_vm2, -1e+09, %v266_v27 }
  0x93   :  { %v332_v31 = vsel %vm331_vm3, %v1238_v29, -inf  ;;  %v1244_v36 = vsel %vm1229_vm2, -1e+09, %v270_v30 }
  0x94   :  { %333 = vmax.xlane.f32.xlu1 %v332_v31  ;;  %v344_v42 = vsel %vm331_vm3, %v1244_v36, -inf }
  0x95   :  { %v210_v32 = vpop.f32.mrf.mxu2 }
  0x96   :  { %v274_v34 = vmul.f32 0.17677669, %v210_v32  ;;  %v254_v35 = vpop.f32.mrf.mxu3 }
  0x97   :  { %v125_v38 = vpop.f32.mrf.mxu0  ;;  %v278_v39 = vmul.f32 0.17677669, %v254_v35 }
  0x98   :  { %v1251_v40 = vsel %vm1229_vm2, -1e+09, %v274_v34  ;;  %v169_v43 = vpop.f32.mrf.mxu1  ;;  %v267_v56 = vmul.f32 0.17677669, %v125_v38 }
  0x99   :  { %v356_v41 = vsel %vm331_vm3, %v1251_v40, -inf  ;;  %v271_v45 = vmul.f32 0.17677669, %v169_v43  ;;  %v1259_v46 = vsel %vm1229_vm2, -1e+09, %v278_v39 }
  0x9a   :  { %357 = vmax.xlane.f32.xlu0 %v356_v41  ;;  %v368_v53 = vsel %vm331_vm3, %v1259_v46, -inf  ;;  %v1292_v1 = vsel %vm1261_vm6, -1e+09, %v267_v56 }
  0x9b   :  { %v1267_v52 = vsel %vm1261_vm6, -1e+09, %v271_v45  ;;  %v335_v6 = vsel %vm331_vm3, %v1292_v1, -inf }
  0x9c   :  { %345 = vmax.xlane.f32.xlu1 %v344_v42  ;;  %v347_v60 = vsel %vm331_vm3, %v1267_v52, -inf }
  0x9d   :  { %v213_v48 = vpop.f32.mrf.mxu2 }
  0x9e   :  { %v275_v50 = vmul.f32 0.17677669, %v213_v48  ;;  %v257_v51 = vpop.f32.mrf.mxu3 }
  0x9f   :  { %v128_v54 = vpop.f32.mrf.mxu0  ;;  %v279_v57 = vmul.f32 0.17677669, %v257_v51 }
  0xa0   :  { %v1273_v58 = vsel %vm1261_vm6, -1e+09, %v275_v50  ;;  %v268_v62 = vmul.f32 0.17677669, %v128_v54  ;;  %v172_v12 = vpop.f32.mrf.mxu1 }
  0xa1   :  { %v359_v59 = vsel %vm331_vm3, %v1273_v58, -inf  ;;  %v1288_v0 = vsel %vm1261_vm6, -1e+09, %v279_v57  ;;  %v272_v21 = vmul.f32 0.17677669, %v172_v12 }
  0xa2   :  { %369 = vmax.xlane.f32.xlu0 %v368_v53  ;;  %360 = vmax.xlane.f32.xlu2 %v359_v59  ;;  %v1296_v4 = vsel %vm1282_vm7, -1e+09, %v268_v62  ;;  %v371_v5 = vsel %vm331_vm3, %v1288_v0, -inf }
  0xa3   :  { %v338_v10 = vsel %vm331_vm3, %v1296_v4, -inf  ;;  %v1328_v25 = vsel %vm1282_vm7, -1e+09, %v272_v21 }
  0xa4   :  { %348 = vmax.xlane.f32.xlu1 %v347_v60  ;;  %v350_v30 = vsel %vm331_vm3, %v1328_v25, -inf }
  0xa5   :  { %v216_v2 = vpop.f32.mrf.mxu2 }
  0xa6   :  { %v260_v3 = vpop.f32.mrf.mxu3  ;;  %v276_v9 = vmul.f32 0.17677669, %v216_v2 }
  0xa7   :  { %v280_v8 = vmul.f32 0.17677669, %v260_v3  ;;  %v131_v27 = vpop.f32.mrf.mxu0 }
  0xa8   :  { %v1306_v13 = vsel %vm1282_vm7, -1e+09, %v276_v9  ;;  %v175_v28 = vpop.f32.mrf.mxu1  ;;  %v269_v32 = vmul.f32 0.17677669, %v131_v27 }
  0xa9   :  { %v1310_v14 = vsel %vm1282_vm7, -1e+09, %v280_v8  ;;  %v362_v19 = vsel %vm331_vm3, %v1306_v13, -inf  ;;  %v273_v33 = vmul.f32 0.17677669, %v175_v28 }
  0xaa   :  { %372 = vmax.xlane.f32.xlu2 %v371_v5  ;;  %336 = vmax.xlane.f32.xlu0 %v335_v6  ;;  %v374_v20 = vsel %vm331_vm3, %v1310_v14, -inf  ;;  %v1344_v35 = vsel %vm1312_vm9, -1e+09, %v269_v32 }
  0xab   :  { %v1340_v34 = vsel %vm1312_vm9, -1e+09, %v273_v33  ;;  %v341_v38 = vsel %vm331_vm3, %v1344_v35, -inf }
  0xac   :  { %339 = vmax.xlane.f32.xlu1 %v338_v10  ;;  %v353_v37 = vsel %vm331_vm3, %v1340_v34, -inf }
  0xad   :  { %v219_v15 = vpop.f32.mrf.mxu2 }
  0xae   :  { %v263_v16 = vpop.f32.mrf.mxu3  ;;  %v277_v22 = vmul.f32 0.17677669, %v219_v15 }
  0xaf   :  { %v281_v18 = vmul.f32 0.17677669, %v263_v16 }
  0xb0   :  { %v1332_v26 = vsel %vm1312_vm9, -1e+09, %v277_v22 }
  0xb1   :  { %v1322_v23 = vsel %vm1312_vm9, -1e+09, %v281_v18  ;;  %v365_v31 = vsel %vm331_vm3, %v1332_v26, -inf }
  0xb2   :  { %363 = vmax.xlane.f32.xlu2 %v362_v19  ;;  %375 = vmax.xlane.f32.xlu0 %v374_v20  ;;  %v377_v24 = vsel %vm331_vm3, %v1322_v23, -inf }
  0xb4   :  { %378 = vmax.xlane.f32.xlu1 %v377_v24 }
  0xba   :  { %351 = vmax.xlane.f32.xlu2 %v350_v30  ;;  %366 = vmax.xlane.f32.xlu0 %v365_v31 }
  0xc2   :  { %354 = vmax.xlane.f32.xlu0 %v353_v37  ;;  %342 = vmax.xlane.f32.xlu2 %v341_v38 }
 0x107   :  { %v334_v39 = vpop.xlane.xlu1 %333 }
 0x108   :  { %v380_v41 = vsub.f32 %v1238_v29, %v334_v39 }
 0x10a   :  { %v396_v42 = vmul.f32 1.442695, %v380_v41 }
 0x10c   :  { %985 = vpow2.f32 %v396_v42 }
 0x10d   :  { %v358_v43 = vpop.xlane.xlu0 %357 }
 0x10e   :  { %v388_v47 = vsub.f32 %v1251_v40, %v358_v43 }
 0x10f   :  { %v346_v44 = vpop.xlane.xlu1 %345 }
 0x110   :  { %v384_v45 = vsub.f32 %v1244_v36, %v346_v44  ;;  %v412_v51 = vmul.f32 1.442695, %v388_v47 }
 0x112   :  { %v1353_v48 = vpop.eup %985  ;;  %v404_v49 = vmul.f32 1.442695, %v384_v45 }
 0x113   :  { %v428_v50 = vsel %vm331_vm3, %v1353_v48, 0.0 }
 0x114   :  { %987 = vpow2.f32 %v404_v49  ;;  %429 = vadd.xlane.f32.xlu0 %v428_v50 }
 0x115   :  { %v370_v53 = vpop.xlane.xlu0 %369  ;;  %v361_v54 = vpop.xlane.xlu2 %360  ;;  %989 = vpow2.f32 %v412_v51 }
 0x116   :  { %v392_v29 = vsub.f32 %v1259_v46, %v370_v53 }
 0x117   :  { %v349_v55 = vpop.xlane.xlu1 %348 }
 0x118   :  { %v420_v56 = vmul.f32 1.442695, %v392_v29  ;;  %v385_v57 = vsub.f32 %v1267_v52, %v349_v55  ;;  %v389_v52 = vsub.f32 %v1273_v58, %v361_v54 }
 0x11a   :  { %v1359_v36 = vpop.eup %987  ;;  %991 = vpow2.f32 %v420_v56  ;;  %v406_v59 = vmul.f32 1.442695, %v385_v57 }
 0x11b   :  { %v440_v40 = vsel %vm331_vm3, %v1359_v36, 0.0  ;;  %v1365_v46 = vpop.eup %989 }
 0x11c   :  { %441 = vadd.xlane.f32.xlu1 %v440_v40  ;;  %993 = vpow2.f32 %v406_v59  ;;  %v716_v40 = vld [vmem:[#allocation7] sm:$0xff]  ;;  %v718_v59 = vld [vmem:[#allocation7 + $0x10] sm:$0xff] }
 0x11d   :  { %v373_v60 = vpop.xlane.xlu2 %372  ;;  %v337_v61 = vpop.xlane.xlu0 %336  ;;  %747 = vmatpush.msrb.mxu0 %v716_v40  ;;  %829 = vmatpush.msrb.mxu2 %v718_v59 }
 0x11e   :  { %v393_v62 = vsub.f32 %v1288_v0, %v373_v60  ;;  %v381_v63 = vsub.f32 %v1292_v1, %v337_v61  ;;  %v452_v0 = vsel %vm331_vm3, %v1365_v46, 0.0  ;;  %v414_v1 = vmul.f32 1.442695, %v389_v52  ;;  %v719_v60 = vld [vmem:[#allocation7 + $0x18] sm:$0xff]  ;;  %v717_v61 = vld [vmem:[#allocation7 + $0x8] sm:$0xff] }
 0x11f   :  { %v340_v7 = vpop.xlane.xlu1 %339  ;;  %870 = vmatpush.msrb.mxu3 %v719_v60  ;;  %788 = vmatpush.msrb.mxu1 %v717_v61 }
 0x120   :  { %v1367_v2 = vpop.eup %991  ;;  %v422_v3 = vmul.f32 1.442695, %v393_v62  ;;  %v398_v5 = vmul.f32 1.442695, %v381_v63  ;;  %v382_v15 = vsub.f32 %v1296_v4, %v340_v7 }
 0x121   :  { %v464_v6 = vsel %vm331_vm3, %v1367_v2, 0.0 }
 0x122   :  { %995 = vpow2.f32 %v422_v3  ;;  %465 = vadd.xlane.f32.xlu2 %v464_v6  ;;  %v1374_v10 = vpop.eup %993 }
 0x123   :  { %997 = vpow2.f32 %v398_v5  ;;  %v443_v20 = vsel %vm331_vm3, %v1374_v10, 0.0 }
 0x124   :  { %453 = vadd.xlane.f32.xlu1 %v452_v0  ;;  %999 = vpow2.f32 %v414_v1 }
 0x125   :  { %v364_v8 = vpop.xlane.xlu2 %363  ;;  %v376_v9 = vpop.xlane.xlu0 %375 }
 0x126   :  { %v390_v58 = vsub.f32 %v1306_v13, %v364_v8  ;;  %v394_v11 = vsub.f32 %v1310_v14, %v376_v9  ;;  %v400_v14 = vmul.f32 1.442695, %v382_v15 }
 0x127   :  { %v379_v21 = vpop.xlane.xlu1 %378 }
 0x128   :  { %v1378_v12 = vpop.eup %995  ;;  %v416_v16 = vmul.f32 1.442695, %v390_v58  ;;  %v424_v17 = vmul.f32 1.442695, %v394_v11  ;;  %v395_v31 = vsub.f32 %v1322_v23, %v379_v21 }
 0x129   :  { %v1381_v18 = vpop.eup %997  ;;  %v467_v19 = vsel %vm331_vm3, %v1378_v12, 0.0 }
 0x12a   :  { %1001 = vpow2.f32 %v416_v16  ;;  %468 = vadd.xlane.f32.xlu0 %v467_v19  ;;  %444 = vadd.xlane.f32.xlu2 %v443_v20  ;;  %v431_v13 = vsel %vm331_vm3, %v1381_v18, 0.0  ;;  %v1389_v24 = vpop.eup %999 }
 0x12b   :  { %1003 = vpow2.f32 %v424_v17  ;;  %v455_v39 = vsel %vm331_vm3, %v1389_v24, 0.0 }
 0x12c   :  { %432 = vadd.xlane.f32.xlu1 %v431_v13  ;;  %1005 = vpow2.f32 %v400_v14 }
 0x12d   :  { %v352_v4 = vpop.xlane.xlu2 %351  ;;  %v367_v22 = vpop.xlane.xlu0 %366 }
 0x12e   :  { %v386_v27 = vsub.f32 %v1328_v25, %v352_v4  ;;  %v391_v28 = vsub.f32 %v1332_v26, %v367_v22  ;;  %v426_v26 = vmul.f32 1.442695, %v395_v31 }
 0x130   :  { %v1393_v30 = vpop.eup %1001  ;;  %v408_v32 = vmul.f32 1.442695, %v386_v27  ;;  %v418_v33 = vmul.f32 1.442695, %v391_v28 }
 0x131   :  { %v1396_v37 = vpop.eup %1003  ;;  %v458_v38 = vsel %vm331_vm3, %v1393_v30, 0.0 }
 0x132   :  { %1007 = vpow2.f32 %v408_v32  ;;  %459 = vadd.xlane.f32.xlu0 %v458_v38  ;;  %456 = vadd.xlane.f32.xlu2 %v455_v39  ;;  %v470_v25 = vsel %vm331_vm3, %v1396_v37, 0.0  ;;  %v1404_v42 = vpop.eup %1005 }
 0x133   :  { %1009 = vpow2.f32 %v418_v33  ;;  %v434_v53 = vsel %vm331_vm3, %v1404_v42, 0.0 }
 0x134   :  { %471 = vadd.xlane.f32.xlu1 %v470_v25  ;;  %1011 = vpow2.f32 %v426_v26 }
 0x135   :  { %v355_v23 = vpop.xlane.xlu0 %354  ;;  %v343_v41 = vpop.xlane.xlu2 %342 }
 0x136   :  { %v387_v43 = vsub.f32 %v1340_v34, %v355_v23  ;;  %v383_v44 = vsub.f32 %v1344_v35, %v343_v41 }
 0x138   :  { %v1408_v45 = vpop.eup %1007  ;;  %v410_v47 = vmul.f32 1.442695, %v387_v43  ;;  %v402_v49 = vmul.f32 1.442695, %v383_v44 }
 0x139   :  { %v1410_v50 = vpop.eup %1009  ;;  %v446_v51 = vsel %vm331_vm3, %v1408_v45, 0.0 }
 0x13a   :  { %1013 = vpow2.f32 %v410_v47  ;;  %447 = vadd.xlane.f32.xlu0 %v446_v51  ;;  %435 = vadd.xlane.f32.xlu2 %v434_v53  ;;  %v461_v34 = vsel %vm331_vm3, %v1410_v50, 0.0  ;;  %v1418_v35 = vpop.eup %1011 }
 0x13b   :  { %1015 = vpow2.f32 %v402_v49  ;;  %v473_v55 = vsel %vm331_vm3, %v1418_v35, 0.0 }
 0x13c   :  { %462 = vadd.xlane.f32.xlu1 %v461_v34 }
 0x140   :  { %v1420_v54 = vpop.eup %1013 }
 0x141   :  { %v1422_v29 = vpop.eup %1015  ;;  %v449_v57 = vsel %vm331_vm3, %v1420_v54, 0.0 }
 0x142   :  { %474 = vadd.xlane.f32.xlu2 %v473_v55  ;;  %v437_v56 = vsel %vm331_vm3, %v1422_v29, 0.0 }
 0x143   :  { %438 = vadd.xlane.f32.xlu0 %v437_v56 }
 0x144   :  { %450 = vadd.xlane.f32.xlu1 %v449_v57 }
 0x187   :  { %v430_v62 = vpop.xlane.xlu0 %429 }
 0x188   :  { %1017 = vrcp.f32 %v430_v62  ;;  %v487_v7 = vand.u32 2147483648, %v430_v62  ;;  %v485_v0 = vand.u32 2147483647, %v430_v62  ;;  %vm481_vm11 = vweird.f32 %v430_v62 }
 0x18a   :  { %v488_v58 = vor.u32 1.1754944e-38, %v487_v7  ;;  %vm486_vm13 = vcmp.eq.f32.partialorder %v485_v0, 8.507059e+37 }
 0x18e   :  { %v1018_v63 = vpop.eup %1017 }
 0x18f   :  { %v477_v52 = vmul.f32 %v1018_v63, %v430_v62  ;;  %v442_v3 = vpop.xlane.xlu1 %441  ;;  %vm482_vm10 = vweird.f32 %v1018_v63 }
 0x190   :  { %1019 = vrcp.f32 %v442_v3  ;;  %vm483_vm12 = vmor %vm481_vm11, %vm482_vm10  ;;  %v543_v21 = vand.u32 2147483648, %v442_v3  ;;  %v541_v22 = vand.u32 2147483647, %v442_v3  ;;  %vm537_vm15 = vweird.f32 %v442_v3 }
 0x191   :  { %v478_v5 = vsub.f32 1.0, %v477_v52 }
 0x192   :  { %v544_v26 = vor.u32 1.1754944e-38, %v543_v21  ;;  %vm542_vm2 = vcmp.eq.f32.partialorder %v541_v22, 8.507059e+37 }
 0x193   :  { %v479_v6 = vmul.f32 %v1018_v63, %v478_v5 }
 0x195   :  { %v480_v1 = vadd.f32 %v1018_v63, %v479_v6  ;;  %v1430_v8 = vpop.xlane.xlu2 %465 }
 0x196   :  { %v1020_v9 = vpop.eup %1019  ;;  %1021 = vrcp.f32 %v1430_v8  ;;  %v653_v32 = vand.u32 2147483647, %v1430_v8  ;;  %v655_v33 = vand.u32 2147483648, %v1430_v8  ;;  %vm649_vm4 = vweird.f32 %v1430_v8 }
 0x197   :  { %v533_v11 = vmul.f32 %v1020_v9, %v442_v3  ;;  %v1433_v15 = vpop.xlane.xlu1 %453  ;;  %v484_v16 = vsel %vm483_vm12, %v1018_v63, %v480_v1  ;;  %vm538_vm14 = vweird.f32 %v1020_v9 }
 0x198   :  { %1023 = vrcp.f32 %v1433_v15  ;;  %v489_v19 = vsel %vm486_vm13, %v488_v58, %v484_v16  ;;  %vm539_vm1 = vmor %vm537_vm15, %vm538_vm14  ;;  %v597_v23 = vand.u32 2147483647, %v1433_v15  ;;  %v599_v41 = vand.u32 2147483648, %v1433_v15 }
 0x199   :  { %v534_v17 = vsub.f32 1.0, %v533_v11  ;;  %v700_v20 = vmul.f32 %v1353_v48, %v489_v19  ;;  %vm1465_vm5 = vcmp.eq.f32.partialorder %v653_v32, 8.507059e+37  ;;  %v656_v51 = vor.u32 1.1754944e-38, %v655_v33 }
 0x19a   :  { %vm593_vm7 = vweird.f32 %v1433_v15  ;;  %vm1476_vm8 = vcmp.eq.f32.partialorder %v597_v23, 8.507059e+37  ;;  %v600_v59 = vor.u32 1.1754944e-38, %v599_v41 }
 0x19b   :  { %v535_v13 = vmul.f32 %v1020_v9, %v534_v17  ;;  %962 = vmatmul.msk.f32.vlgmr.msrb.gmra.mxu0 %vm331_vm3, %v700_v20  ;;  %900 = vst.msk [vmem:[%s1924_s5] sm:$0xff] %vm331_vm3, %v700_v20 }
 0x19c   :  { %v1437_v14 = vpop.eup %1021 }
 0x19d   :  { %v536_v4 = vadd.f32 %v1020_v9, %v535_v13  ;;  %v645_v27 = vmul.f32 %v1437_v14, %v1430_v8  ;;  %v1446_v28 = vpop.xlane.xlu0 %468  ;;  %v1448_v48 = vpop.xlane.xlu2 %444  ;;  %vm650_vm6 = vweird.f32 %v1437_v14 }
 0x19e   :  { %v1450_v31 = vpop.eup %1023  ;;  %1025 = vrcp.f32 %v1446_v28  ;;  %v669_v60 = vand.u32 2147483648, %v1446_v28  ;;  %vm1503_vm10 = vmor %vm649_vm4, %vm650_vm6  ;;  %v555_v1 = vand.u32 2147483647, %v1448_v48  ;;  %vm663_vm11 = vweird.f32 %v1446_v28 }
 0x19f   :  { %v646_v38 = vsub.f32 1.0, %v645_v27  ;;  %v589_v39 = vmul.f32 %v1450_v31, %v1433_v15  ;;  %1027 = vrcp.f32 %v1448_v48  ;;  %v1458_v25 = vpop.xlane.xlu1 %432  ;;  %v540_v47 = vsel %vm539_vm1, %v1020_v9, %v536_v4 }
 0x1a0   :  { %1029 = vrcp.f32 %v1458_v25  ;;  %v545_v53 = vsel %vm542_vm2, %v544_v26, %v540_v47  ;;  %vm594_vm9 = vweird.f32 %v1450_v31  ;;  %v501_v63 = vand.u32 2147483648, %v1458_v25 }
 0x1a1   :  { %v647_v43 = vmul.f32 %v1437_v14, %v646_v38  ;;  %v590_v44 = vsub.f32 1.0, %v589_v39  ;;  %v704_v56 = vmul.f32 %v1359_v36, %v545_v53  ;;  %v557_v36 = vand.u32 2147483648, %v1448_v48  ;;  %vm595_vm13 = vmor %vm593_vm7, %vm594_vm9 }
 0x1a2   :  { %v1521_v16 = vor.u32 1.1754944e-38, %v669_v60  ;;  %vm551_vm12 = vweird.f32 %v1448_v48  ;;  %v1529_v13 = vor.u32 1.1754944e-38, %v501_v63  ;;  %v667_v21 = vand.u32 2147483647, %v1446_v28 }
 0x1a3   :  { %v648_v34 = vadd.f32 %v1437_v14, %v647_v43  ;;  %v591_v55 = vmul.f32 %v1450_v31, %v590_v44  ;;  %966 = vmatmul.msk.f32.vlgmr.msrb.gmra.mxu1 %vm331_vm3, %v704_v56  ;;  %904 = vst.msk [vmem:[%s1924_s5 + $0x20] sm:$0xff] %vm331_vm3, %v704_v56  ;;  %v558_v19 = vor.u32 1.1754944e-38, %v557_v36  ;;  %vm495_vm14 = vweird.f32 %v1458_v25 }
 0x1a4   :  { %v1473_v57 = vpop.eup %1025  ;;  %vm1542_vm15 = vcmp.eq.f32.partialorder %v555_v1, 8.507059e+37  ;;  %vm1584_vm4 = vcmp.eq.f32.partialorder %v667_v21, 8.507059e+37 }
 0x1a5   :  { %v1481_v61 = vpop.eup %1027  ;;  %v659_v62 = vmul.f32 %v1473_v57, %v1446_v28  ;;  %v1493_v52 = vpop.xlane.xlu0 %459  ;;  %v592_v7 = vadd.f32 %v1450_v31, %v591_v55  ;;  %v652_v11 = vsel %vm1503_vm10, %v1437_v14, %v648_v34  ;;  %vm664_vm1 = vweird.f32 %v1473_v57 }
 0x1a6   :  { %v1495_v3 = vpop.xlane.xlu2 %456  ;;  %v1497_v5 = vpop.eup %1029  ;;  %v547_v0 = vmul.f32 %v1481_v61, %v1448_v48  ;;  %1031 = vrcp.f32 %v1493_v52  ;;  %v657_v22 = vsel %vm1465_vm5, %v656_v51, %v652_v11  ;;  %v627_v26 = vand.u32 2147483648, %v1493_v52  ;;  %vm1594_vm5 = vmor %vm663_vm11, %vm664_vm1 }
 0x1a7   :  { %v660_v9 = vsub.f32 1.0, %v659_v62  ;;  %v491_v58 = vmul.f32 %v1497_v5, %v1458_v25  ;;  %1033 = vrcp.f32 %v1495_v3  ;;  %v1516_v8 = vpop.xlane.xlu1 %471  ;;  %v596_v27 = vsel %vm595_vm13, %v1450_v31, %v592_v7 }
 0x1a8   :  { %v548_v17 = vsub.f32 1.0, %v547_v0  ;;  %1035 = vrcp.f32 %v1516_v8  ;;  %v712_v32 = vmul.f32 %v1367_v2, %v657_v22  ;;  %v601_v33 = vsel %vm1476_vm8, %v600_v59, %v596_v27 }
 0x1a9   :  { %v492_v20 = vsub.f32 1.0, %v491_v58  ;;  %v661_v14 = vmul.f32 %v1473_v57, %v660_v9  ;;  %v708_v23 = vmul.f32 %v1365_v46, %v601_v33  ;;  %v499_v31 = vand.u32 2147483647, %v1458_v25 }
 0x1aa   :  { %v549_v4 = vmul.f32 %v1481_v61, %v548_v17  ;;  %v613_v43 = vand.u32 2147483648, %v1495_v3  ;;  %v683_v44 = vand.u32 2147483648, %v1516_v8  ;;  %974 = vmatmul.msk.f32.vlgmr.msrb.gmra.mxu3 %vm331_vm3, %v712_v32  ;;  %912 = vst.msk [vmem:[%s1924_s5 + $0x60] sm:$0xff] %vm331_vm3, %v712_v32  ;;  %vm552_vm2 = vweird.f32 %v1481_v61 }
 0x1ab   :  { %v493_v15 = vmul.f32 %v1497_v5, %v492_v20  ;;  %970 = vmatmul.msk.f32.vlgmr.msrb.gmra.mxu2 %vm331_vm3, %v708_v23  ;;  %908 = vst.msk [vmem:[%s1924_s5 + $0x40] sm:$0xff] %vm331_vm3, %v708_v23  ;;  %v662_v34 = vadd.f32 %v1473_v57, %v661_v14  ;;  %vm496_vm6 = vweird.f32 %v1497_v5  ;;  %v1599_v63 = vor.u32 1.1754944e-38, %v627_v26  ;;  %vm553_vm7 = vmor %vm551_vm12, %vm552_vm2 }
 0x1ac   :  { %v1546_v39 = vpop.eup %1031  ;;  %v550_v49 = vadd.f32 %v1481_v61, %v549_v4  ;;  %v1601_v6 = vor.u32 1.1754944e-38, %v613_v43  ;;  %v1605_v0 = vor.u32 1.1754944e-38, %v683_v44  ;;  %vm607_vm8 = vweird.f32 %v1495_v3  ;;  %vm497_vm10 = vmor %vm495_vm14, %vm496_vm6 }
 0x1ad   :  { %v1552_v41 = vpop.eup %1033  ;;  %v617_v2 = vmul.f32 %v1546_v39, %v1493_v52  ;;  %v1563_v46 = vpop.xlane.xlu0 %447  ;;  %v494_v59 = vadd.f32 %v1497_v5, %v493_v15  ;;  %v666_v9 = vsel %vm1594_vm5, %v1473_v57, %v662_v34  ;;  %vm500_vm9 = vcmp.eq.f32.partialorder %v499_v31, 8.507059e+37 }
 0x1ae   :  { %v1565_v47 = vpop.xlane.xlu2 %435  ;;  %v1568_v51 = vpop.eup %1035  ;;  %v603_v53 = vmul.f32 %v1552_v41, %v1495_v3  ;;  %1037 = vrcp.f32 %v1563_v46  ;;  %v571_v55 = vand.u32 2147483648, %v1563_v46  ;;  %v554_v1 = vsel %vm553_vm7, %v1481_v61, %v550_v49 }
 0x1af   :  { %1039 = vrcp.f32 %v1565_v47  ;;  %v1582_v56 = vpop.xlane.xlu1 %462  ;;  %v618_v60 = vsub.f32 1.0, %v617_v2  ;;  %v673_v7 = vmul.f32 %v1568_v51, %v1516_v8  ;;  %v515_v11 = vand.u32 2147483648, %v1565_v47 }
 0x1b0   :  { %v604_v62 = vsub.f32 1.0, %v603_v53  ;;  %1041 = vrcp.f32 %v1582_v56  ;;  %v1617_v58 = vor.u32 1.1754944e-38, %v571_v55  ;;  %v559_v17 = vsel %vm1542_vm15, %v558_v19, %v554_v1 }
 0x1b1   :  { %v671_v48 = vsel %vm1584_vm4, %v1521_v16, %v666_v9  ;;  %v1632_v57 = vmul.f32 %v1546_v39, %v618_v60  ;;  %v705_v20 = vmul.f32 %v1374_v10, %v559_v17  ;;  %v498_v19 = vsel %vm497_vm10, %v1497_v5, %v494_v59 }
 0x1b2   :  { %v605_v28 = vmul.f32 %v1552_v41, %v604_v62  ;;  %v713_v21 = vmul.f32 %v1378_v12, %v671_v48  ;;  %v674_v4 = vsub.f32 1.0, %v673_v7  ;;  %v503_v25 = vsel %vm500_vm9, %v1529_v13, %v498_v19 }
 0x1b3   :  { %v641_v12 = vand.u32 2147483648, %v1582_v56  ;;  %967 = vmatmul.msk.f32.gmra.mxu1 %vm331_vm3, %v705_v20  ;;  %905 = vst.msk [vmem:[%s1924_s5 + $0x28] sm:$0xff] %vm331_vm3, %v705_v20  ;;  %v701_v5 = vmul.f32 %v1381_v18, %v503_v25  ;;  %vm677_vm11 = vweird.f32 %v1516_v8  ;;  %vm608_vm12 = vweird.f32 %v1552_v41 }
 0x1b4   :  { %v1629_v61 = vpop.eup %1037  ;;  %v606_v27 = vadd.f32 %v1552_v41, %v605_v28  ;;  %975 = vmatmul.msk.f32.gmra.mxu3 %vm331_vm3, %v713_v21  ;;  %913 = vst.msk [vmem:[%s1924_s5 + $0x68] sm:$0xff] %vm331_vm3, %v713_v21  ;;  %v611_v31 = vand.u32 2147483647, %v1495_v3  ;;  %v675_v2 = vmul.f32 %v1568_v51, %v674_v4  ;;  %vm509_vm13 = vweird.f32 %v1565_v47  ;;  %vm609_vm15 = vmor %vm607_vm8, %vm608_vm12 }
 0x1b5   :  { %v1637_v14 = vpop.eup %1039  ;;  %v561_v16 = vmul.f32 %v1629_v61, %v1563_v46  ;;  %963 = vmatmul.msk.f32.gmra.mxu0 %vm331_vm3, %v701_v5  ;;  %901 = vst.msk [vmem:[%s1924_s5 + $0x8] sm:$0xff] %vm331_vm3, %v701_v5  ;;  %v1681_v43 = vor.u32 1.1754944e-38, %v515_v11  ;;  %v1685_v53 = vor.u32 1.1754944e-38, %v641_v12  ;;  %vm565_vm1 = vweird.f32 %v1563_v46 }
 0x1b6   :  { %v1642_v22 = vpop.xlane.xlu2 %474  ;;  %v1645_v15 = vpop.eup %1041  ;;  %v505_v10 = vmul.f32 %v1637_v14, %v1565_v47  ;;  %v610_v1 = vsel %vm609_vm15, %v1552_v41, %v606_v27  ;;  %vm612_vm2 = vcmp.eq.f32.partialorder %v611_v31, 8.507059e+37  ;;  %vm621_vm4 = vweird.f32 %v1493_v52 }
 0x1b7   :  { %v1657_v13 = vpop.xlane.xlu0 %438  ;;  %1043 = vrcp.f32 %v1642_v22  ;;  %v562_v32 = vsub.f32 1.0, %v561_v16  ;;  %v631_v33 = vmul.f32 %v1645_v15, %v1582_v56  ;;  %v1668_v38 = vpop.xlane.xlu1 %450  ;;  %v697_v23 = vand.u32 2147483648, %v1642_v22 }
 0x1b8   :  { %1045 = vrcp.f32 %v1657_v13  ;;  %v506_v18 = vsub.f32 1.0, %v505_v10  ;;  %v529_v26 = vand.u32 2147483648, %v1657_v13  ;;  %v527_v34 = vand.u32 2147483647, %v1657_v13 }
 0x1b9   :  { %v632_v44 = vsub.f32 1.0, %v631_v33  ;;  %1047 = vrcp.f32 %v1668_v38  ;;  %v563_v49 = vmul.f32 %v1629_v61, %v562_v32  ;;  %v695_v55 = vand.u32 2147483647, %v1642_v22 }
 0x1ba   :  { %v507_v40 = vmul.f32 %v1637_v14, %v506_v18  ;;  %vm523_vm14 = vweird.f32 %v1657_v13  ;;  %v1694_v60 = vor.u32 1.1754944e-38, %v529_v26  ;;  %v1696_v62 = vor.u32 1.1754944e-38, %v697_v23 }
 0x1bb   :  { %v1691_v59 = vmul.f32 %v1645_v15, %v632_v44  ;;  %v583_v7 = vand.u32 2147483647, %v1668_v38  ;;  %v585_v28 = vand.u32 2147483648, %v1668_v38  ;;  %v615_v3 = vsel %vm612_vm2, %v1601_v6, %v610_v1 }
 0x1bc   :  { %v676_v17 = vadd.f32 %v1568_v51, %v675_v2  ;;  %vm1719_vm7 = vcmp.eq.f32.partialorder %v527_v34, 8.507059e+37  ;;  %vm691_vm8 = vweird.f32 %v1642_v22  ;;  %v709_v21 = vmul.f32 %v1389_v24, %v615_v3 }
 0x1bd   :  { %v1702_v36 = vpop.eup %1043  ;;  %v1724_v20 = vor.u32 1.1754944e-38, %v585_v28  ;;  %vm678_vm10 = vweird.f32 %v1568_v51  ;;  %v681_v4 = vand.u32 2147483647, %v1516_v8  ;;  %v508_v16 = vadd.f32 %v1637_v14, %v507_v40 }
 0x1be   :  { %v1708_v9 = vpop.eup %1045  ;;  %v687_v11 = vmul.f32 %v1702_v36, %v1642_v22  ;;  %vm692_vm5 = vweird.f32 %v1702_v36  ;;  %971 = vmatmul.msk.f32.gmra.mxu2 %vm331_vm3, %v709_v21  ;;  %909 = vst.msk [vmem:[%s1924_s5 + $0x48] sm:$0xff] %vm331_vm3, %v709_v21  ;;  %vm679_vm2 = vmor %vm677_vm11, %vm678_vm10  ;;  %vm510_vm0 = vweird.f32 %v1637_v14  ;;  %vm1746_vm12 = vcmp.eq.f32.partialorder %v695_v55, 8.507059e+37 }
 0x1bf   :  { %v519_v48 = vmul.f32 %v1708_v9, %v1657_v13  ;;  %vm524_vm6 = vweird.f32 %v1708_v9  ;;  %v1727_v19 = vpop.eup %1047  ;;  %v680_v12 = vsel %vm679_vm2, %v1568_v51, %v676_v17  ;;  %vm682_vm9 = vcmp.eq.f32.partialorder %v681_v4, 8.507059e+37  ;;  %vm511_vm11 = vmor %vm509_vm13, %vm510_vm0 }
 0x1c0   :  { %v688_v6 = vsub.f32 1.0, %v687_v11  ;;  %v575_v27 = vmul.f32 %v1727_v19, %v1668_v38  ;;  %v513_v5 = vand.u32 2147483647, %v1565_v47  ;;  %vm1753_vm15 = vcmp.eq.f32.partialorder %v583_v7, 8.507059e+37  ;;  %vm1769_vm2 = vmor %vm523_vm14, %vm524_vm6 }
 0x1c1   :  { %v520_v25 = vsub.f32 1.0, %v519_v48  ;;  %v685_v8 = vsel %vm682_vm9, %v1605_v0, %v680_v12  ;;  %v564_v26 = vadd.f32 %v1629_v61, %v563_v49  ;;  %v512_v31 = vsel %vm511_vm11, %v1637_v14, %v508_v16 }
 0x1c2   :  { %v689_v24 = vmul.f32 %v1702_v36, %v688_v6  ;;  %v576_v33 = vsub.f32 1.0, %v575_v27  ;;  %v714_v51 = vmul.f32 %v1396_v37, %v685_v8  ;;  %vm514_vm10 = vcmp.eq.f32.partialorder %v513_v5, 8.507059e+37 }
 0x1c3   :  { %v521_v32 = vmul.f32 %v1708_v9, %v520_v25  ;;  %v517_v44 = vsel %vm514_vm10, %v1681_v43, %v512_v31  ;;  %vm566_vm0 = vweird.f32 %v1629_v61  ;;  %v569_v13 = vand.u32 2147483647, %v1563_v46 }
 0x1c4   :  { %v690_v23 = vadd.f32 %v1702_v36, %v689_v24  ;;  %v577_v47 = vmul.f32 %v1727_v19, %v576_v33  ;;  %976 = vmatmul.msk.f32.gmra.mxu3 %vm331_vm3, %v714_v51  ;;  %914 = vst.msk [vmem:[%s1924_s5 + $0x70] sm:$0xff] %vm331_vm3, %v714_v51  ;;  %v702_v37 = vmul.f32 %v1404_v42, %v517_v44  ;;  %vm1784_vm13 = vmor %vm565_vm1, %vm566_vm0  ;;  %vm622_vm14 = vweird.f32 %v1546_v39 }
 0x1c5   :  { %v522_v2 = vadd.f32 %v1708_v9, %v521_v32  ;;  %v620_v43 = vadd.f32 %v1546_v39, %v1632_v57  ;;  %v568_v34 = vsel %vm1784_vm13, %v1629_v61, %v564_v26  ;;  %vm1798_vm6 = vmor %vm621_vm4, %vm622_vm14  ;;  %v625_v55 = vand.u32 2147483647, %v1493_v52 }
 0x1c6   :  { %v578_v49 = vadd.f32 %v1727_v19, %v577_v47  ;;  %vm1810_vm1 = vmor %vm691_vm8, %vm692_vm5  ;;  %964 = vmatmul.msk.f32.gmra.mxu0 %vm331_vm3, %v702_v37  ;;  %902 = vst.msk [vmem:[%s1924_s5 + $0x10] sm:$0xff] %vm331_vm3, %v702_v37  ;;  %vm570_vm4 = vcmp.eq.f32.partialorder %v569_v13, 8.507059e+37  ;;  %v634_v22 = vadd.f32 %v1645_v15, %v1691_v59  ;;  %vm1960_vm5 = vweird.f32 %v1727_v19 }
 0x1c7   :  { %v526_v46 = vsel %vm1769_vm2, %v1708_v9, %v522_v2  ;;  %v624_v52 = vsel %vm1798_vm6, %v1546_v39, %v620_v43  ;;  %vm1961_vm8 = vweird.f32 %v1668_v38  ;;  %v573_v7 = vsel %vm570_vm4, %v1617_v58, %v568_v34 }
 0x1c8   :  { %v531_v61 = vsel %vm1719_vm7, %v1694_v60, %v526_v46  ;;  %vm1831_vm9 = vmor %vm1961_vm8, %vm1960_vm5  ;;  %vm626_vm11 = vcmp.eq.f32.partialorder %v625_v55, 8.507059e+37  ;;  %vm636_vm10 = vweird.f32 %v1645_v15  ;;  %v706_v60 = vmul.f32 %v1408_v45, %v573_v7 }
 0x1c9   :  { %v703_v39 = vmul.f32 %v1422_v29, %v531_v61  ;;  %v629_v28 = vsel %vm626_vm11, %v1599_v63, %v624_v52  ;;  %vm1964_vm7 = vweird.f32 %v1582_v56  ;;  %v639_v38 = vand.u32 2147483647, %v1582_v56 }
 0x1ca   :  { %vm1842_vm2 = vmor %vm1964_vm7, %vm636_vm10  ;;  %v694_v58 = vsel %vm1810_vm1, %v1702_v36, %v690_v23  ;;  %v710_v29 = vmul.f32 %v1393_v30, %v629_v28  ;;  %v582_v56 = vsel %vm1831_vm9, %v1727_v19, %v578_v49  ;;  %968 = vmatmul.msk.f32.gmra.mxu1 %vm331_vm3, %v706_v60  ;;  %906 = vst.msk [vmem:[%s1924_s5 + $0x30] sm:$0xff] %vm331_vm3, %v706_v60 }
 0x1cb   :  { %903 = vst.msk [vmem:[%s1924_s5 + $0x18] sm:$0xff] %vm331_vm3, %v703_v39  ;;  %v638_v45 = vsel %vm1842_vm2, %v1645_v15, %v634_v22  ;;  %v699_v63 = vsel %vm1746_vm12, %v1696_v62, %v694_v58  ;;  %vm640_vm0 = vcmp.eq.f32.partialorder %v639_v38, 8.507059e+37  ;;  %v587_v15 = vsel %vm1753_vm15, %v1724_v20, %v582_v56 }
 0x1cc   :  { %v715_v30 = vmul.f32 %v1418_v35, %v699_v63  ;;  %972 = vmatmul.msk.f32.gmra.mxu2 %vm331_vm3, %v710_v29  ;;  %910 = vst.msk [vmem:[%s1924_s5 + $0x50] sm:$0xff] %vm331_vm3, %v710_v29  ;;  %v643_v62 = vsel %vm640_vm0, %v1685_v53, %v638_v45  ;;  %v707_v36 = vmul.f32 %v1420_v54, %v587_v15  ;;  %vm1967_vm12 = vcmask 261120  }
 0x1cd   :  { %v711_v1 = vmul.f32 %v1410_v50, %v643_v62  ;;  %vm1968_vm15 = vmmov %vm1967_vm12 }
 0x1ce   :  { %977 = vmatmul.msk.f32.gmra.mxu3 %vm331_vm3, %v715_v30  ;;  %915 = vst.msk [vmem:[%s1924_s5 + $0x78] sm:$0xff] %vm331_vm3, %v715_v30  ;;  %965 = vmatmul.msk.f32.gmra.mxu0 %vm331_vm3, %v703_v39  ;;  %vm1969_vm13 = vmmov %vm1967_vm12 }
 0x1cf   :  { %907 = vst.msk [vmem:[%s1924_s5 + $0x38] sm:$0xff] %vm331_vm3, %v707_v36  ;;  %vm1970_vm14 = vmmov %vm1967_vm12 }
 0x1d0   :  { %911 = vst.msk [vmem:[%s1924_s5 + $0x58] sm:$0xff] %vm331_vm3, %v711_v1  ;;  %vm1971_vm6 = vmmov %vm1967_vm12  ;;  %s1157_s5 = smov [#allocation8]  }
 0x1d1   :  { %vm1972_vm1 = vmmov %vm1971_vm6  ;;  %s920_s19 = sshll.u32 %s1157_s5, 4  ;;  %s921_s19 = int_to_ptr.vmem [resolvable:$true] %s920_s19 }
 0x1d2   :  { %969 = vmatmul.msk.f32.gmra.mxu1 %vm331_vm3, %v707_v36  ;;  %vm1974_vm4 = vmmov %vm1972_vm1 }
 0x1d3   :  { %vm1975_vm5 = vmmov %vm1972_vm1 }
 0x1d4   :  { %973 = vmatmul.msk.f32.gmra.mxu2 %vm331_vm3, %v711_v1  ;;  %vm1973_vm3 = vmmov %vm1972_vm1 }
 0x1d5   :  { %vm1976_vm8 = vmmov %vm1972_vm1 }
 0x1d6   :  { %vm1977_vm9 = vmmov %vm1972_vm1 }
 0x1d7   :  { %vm1978_vm11 = vmmov %vm1972_vm1 }
 0x1d8   :  { %vm1979_vm10 = vmmov %vm1972_vm1 }
 0x1d9   :  { %vm1980_vm7 = vmmov %vm1972_vm1 }
 0x1da   :  { %vm1981_vm2 = vmmov %vm1972_vm1 }
 0x1db   :  { %vm1982_vm0 = vmmov %vm1972_vm1 }
 0x218   :  { %v749_v50 = vpop.f32.mrf.mxu0 }
 0x219   :  { %884 = vst.msk [vmem:[#allocation8] sm:$0xff] %vm1967_vm12, %v749_v50 }
 0x220   :  { %v790_v35 = vpop.f32.mrf.mxu1 }
 0x221   :  { %888 = vst.msk [vmem:[#allocation8 + $0x20] sm:$0xff] %vm1968_vm15, %v790_v35 }
 0x22d   :  { %v872_v54 = vpop.f32.mrf.mxu3 }
 0x22e   :  { %896 = vst.msk [vmem:[#allocation8 + $0x60] sm:$0xff] %vm1969_vm13, %v872_v54  ;;  %v831_v53 = vpop.f32.mrf.mxu2 }
 0x22f   :  { %892 = vst.msk [vmem:[#allocation8 + $0x40] sm:$0xff] %vm1970_vm14, %v831_v53 }
 0x230   :  { %v793_v9 = vpop.f32.mrf.mxu1 }
 0x231   :  { %889 = vst.msk [vmem:[#allocation8 + $0x28] sm:$0xff] %vm1971_vm6, %v793_v9 }
 0x232   :  { %v752_v11 = vpop.f32.mrf.mxu0 }
 0x233   :  { %885 = vst.msk [vmem:[#allocation8 + $0x8] sm:$0xff] %vm1972_vm1, %v752_v11 }
 0x237   :  { %v875_v3 = vpop.f32.mrf.mxu3 }
 0x238   :  { %897 = vst.msk [vmem:[#allocation8 + $0x68] sm:$0xff] %vm1973_vm3, %v875_v3 }
 0x241   :  { %v834_v17 = vpop.f32.mrf.mxu2 }
 0x242   :  { %893 = vst.msk [vmem:[#allocation8 + $0x48] sm:$0xff] %vm1974_vm4, %v834_v17 }
 0x243   :  { %v755_v48 = vpop.f32.mrf.mxu0 }
 0x244   :  { %886 = vst.msk [vmem:[#allocation8 + $0x10] sm:$0xff] %vm1975_vm5, %v755_v48 }
 0x247   :  { %v796_v41 = vpop.f32.mrf.mxu1  ;;  %v878_v20 = vpop.f32.mrf.mxu3 }
 0x248   :  { %890 = vst.msk [vmem:[#allocation8 + $0x30] sm:$0xff] %vm1976_vm8, %v796_v41 }
 0x249   :  { %898 = vst.msk [vmem:[#allocation8 + $0x70] sm:$0xff] %vm1977_vm9, %v878_v20 }
 0x24b   :  { %v758_v21 = vpop.f32.mrf.mxu0 }
 0x24c   :  { %887 = vst.msk [vmem:[#allocation8 + $0x18] sm:$0xff] %vm1978_vm11, %v758_v21 }
 0x24f   :  { %v837_v19 = vpop.f32.mrf.mxu2  ;;  %v799_v6 = vpop.f32.mrf.mxu1 }
 0x250   :  { %894 = vst.msk [vmem:[#allocation8 + $0x50] sm:$0xff] %vm1979_vm10, %v837_v19 }
 0x251   :  { %v881_v4 = vpop.f32.mrf.mxu3  ;;  %891 = vst.msk [vmem:[#allocation8 + $0x38] sm:$0xff] %vm1980_vm7, %v799_v6 }
 0x252   :  { %899 = vst.msk [vmem:[#allocation8 + $0x78] sm:$0xff] %vm1981_vm2, %v881_v4 }
 0x257   :  { %v840_v16 = vpop.f32.mrf.mxu2 }
 0x258   :  { %895 = vst.msk [vmem:[#allocation8 + $0x58] sm:$0xff] %vm1982_vm0, %v840_v16 }
 0x259   :  { %928 = dma.vmem_to_hbm [thread:$0]  %s921_s19, 2048, %s923_s22, [#allocation4], %s1152_s26, %s1152_s26, %s1153_s27  }
 0x25a   :  { %1149 = dma.done.wait [#allocation4], 2048  }
 0x25b   :  { %1150 = vsyncadd [#allocation4], 4294965248 }
 0x25c   :  { %937 = vsyncpa [#allocation3], 1 }
 0x25d   :  { %938 = vsyncpa [#allocation6], 1 }
 0x25e   :  { %939 = vsyncpa [#allocation4], 1 }

</bundles_post_ra>
